<compile_context>
chip_gen: v5e
topology: v5e:2x2
jax: 0.10.0
libtpu: 0.0.40
codegen_flags: <defaults>
</compile_context>

<pallas_src>
import functools

import jax
import jax.numpy as jnp
from jax.experimental import pallas as pl
from jax.experimental.pallas import tpu as pltpu


# ----------------------------------------------------------------------------
# Quaternion weight construction (glue, plain JAX)
# ----------------------------------------------------------------------------
def quaternion_hamilton_matrix(r, i, j, k):
    """Real (in_features, out_features) matrix equivalent to
    QuaternionLinearAutograd, from the 4 (in/4, out/4) component weights."""
    col_r = jnp.concatenate([r, -i, -j, -k], axis=0)
    col_i = jnp.concatenate([i,  r, -k,  j], axis=0)
    col_j = jnp.concatenate([j,  k,  r, -i], axis=0)
    col_k = jnp.concatenate([k, -j,  i,  r], axis=0)
    return jnp.concatenate([col_r, col_i, col_j, col_k], axis=1)


def init_quaternion_linear(key, in_features, out_features, bias=True):
    assert in_features % 4 == 0 and out_features % 4 == 0
    kin, kout = in_features // 4, out_features // 4
    keys = jax.random.split(key, 4)
    scale = 1.0 / jnp.sqrt(2.0 * (kin + kout))
    r, i, j, k = [scale * jax.random.normal(kk, (kin, kout), dtype=jnp.float32)
                  for kk in keys]
    w = quaternion_hamilton_matrix(r, i, j, k)
    b = jnp.zeros((1, out_features), dtype=jnp.float32)  # bias initialised to 0
    del bias
    return w, b


def _apply_act(x, act_type):
    if act_type == "relu":
        return jnp.maximum(x, 0.0)
    if act_type == "tanh":
        return jnp.tanh(x)
    if act_type == "sigmoid":
        return jax.nn.sigmoid(x)
    if act_type == "leaky_relu":
        return jnp.where(x > 0.0, x, 0.2 * x)
    if act_type == "linear":
        return x
    # TODO(synk): prelu / hardtanh / elu / log-softmax activations not implemented.
    raise ValueError(f"unsupported act: {act_type}")


def _round_up(n, m):
    return ((n + m - 1) // m) * m


def _vmem_capacity_bytes():
    try:
        return int(pltpu.get_tpu_info().vmem_capacity_bytes)
    except Exception:
        return 64 * 2 ** 20          # conservative (v7x per-core physical VMEM)


# ----------------------------------------------------------------------------
# Fused multi-layer li-GRU Pallas kernel
# ----------------------------------------------------------------------------
def qligru_fused_kernel(x_ref, *refs, n_layers, TT, Bc, Hp, layer_meta, mxu_dtype):
    """refs = [Wcat_0, bcat_0, Ucat_0, ..., out_ref, h_state_0..n-1, wx_scr, seq_scr]

    Shapes (lane-dense):
      x_ref     : (TT*Bc, D_in)  f32     current time block of this batch chunk
      Wcat_l    : (D_l, G_l)     mxu_dtype   [Wz | Wh], zero padded
      bcat_l    : (1, G_l)       f32         [bz | bh]
      Ucat_l    : (Hp, G_l)      mxu_dtype   [Uz | Uh]
      out_ref   : (TT*Bc, Hp)    f32     last layer's output block
      h_state_l : (Bc, Hp)       f32     hidden state carried across time blocks
      wx_scr    : (TT*Bc, Gmax)  f32     hoisted input projection (per layer)
      seq_scr   : (TT*Bc, Hp)    f32     inter-layer activation (stays in VMEM)
    """
    weight_refs = refs[:3 * n_layers]
    out_ref = refs[3 * n_layers]
    h_states = refs[3 * n_layers + 1: 3 * n_layers + 1 + n_layers]
    wx_scr = refs[3 * n_layers + 1 + n_layers]
    seq_scr = refs[3 * n_layers + 2 + n_layers]

    # zero carried hidden states at the first time block of every batch chunk
    @pl.when(pl.program_id(1) == 0)
    def _init():
        for hs in h_states:
            hs[...] = jnp.zeros_like(hs)

    cur = x_ref[...]                                   # (TT*Bc, D_in) f32
    for li in range(n_layers):
        act, drop_scale, Hl, Gl, packed = layer_meta[li]
        wcat_ref = weight_refs[3 * li + 0]
        bcat_ref = weight_refs[3 * li + 1]
        ucat_ref = weight_refs[3 * li + 2]
        h_state = h_states[li]
        dst_ref = out_ref if li == n_layers - 1 else seq_scr

        # --- hoisted input projection: one MXU matmul for the whole block
        #     (bf16 operands, f32 accumulate), biases folded in here.
        wx_scr[:, 0:Gl] = (
            jnp.dot(cur.astype(mxu_dtype), wcat_ref[...],
                    preferred_element_type=jnp.float32)
            + bcat_ref[...])

        # static per-lane scale: drop scalar on real hidden lanes, 0 on padding
        # (hoisted outside the serial loop; keeps padded lanes exactly zero for
        #  ANY activation, not just ones with act(0)=0).
        needs_scale = (drop_scale != 1.0) or (Hl < Hp)
        if needs_scale:
            lane = jax.lax.broadcasted_iota(jnp.int32, (Bc, Hp), dimension=1)
            hscale = jnp.where(lane < Hl, jnp.float32(drop_scale),
                               jnp.float32(0.0))

        # --- serial recurrence over the time block (single fused gate matmul
        #     per step: h @ [Uz | Uh], RHS streamed from VMEM, not pinned).
        def step(t, h):
            row = pl.multiple_of(t * Bc, Bc)
            g = wx_scr[pl.ds(row, Bc), 0:Gl] + jnp.dot(
                h.astype(mxu_dtype), ucat_ref[...],
                preferred_element_type=jnp.float32)        # (Bc, Gl) f32
            if packed:
                # z at lanes [0,Hl), h-cand at lanes [Gl/2, Gl/2+Hl): a rotate
                # by half the width is its own inverse -> direction agnostic.
                zt = jax.nn.sigmoid(g)                      # Gl == Hp here
                a = pltpu.roll(g, Gl // 2, axis=1)
            else:
                zt = jax.nn.sigmoid(g[:, :Hp])
                a = g[:, Hp:]
            hcand = _apply_act(a, act)
            if needs_scale:
                hcand = hcand * hscale
            h_new = hcand + zt * (h - hcand)                # == z*h + (1-z)*hcand
            dst_ref[pl.ds(row, Bc), :] = h_new
            return h_new

        h_final = jax.lax.fori_loop(0, TT, step, h_state[...],
                                    unroll=min(TT, 8))      # partial unroll
        h_state[...] = h_final                              # carry across blocks

        if li < n_layers - 1:
            cur = seq_scr[...]                               # next layer input


# ----------------------------------------------------------------------------
# Wrapper: packing, padding, pallas_call
# ----------------------------------------------------------------------------
def _pack_layer(Wh, bh, Wz, bz, Uh, Uz, din_pad, Hp, Gl, mxu_dtype):
    """Concat z|h weights into one gate matrix of width Gl (half per gate) and
    zero-pad to lane-dense shapes.  Weights cast to the MXU dtype; bias f32."""
    half = Gl // 2

    def pad2(a, rows, cols):
        return jnp.pad(a, ((0, rows - a.shape[0]), (0, cols - a.shape[1])))

    Wcat = jnp.concatenate([pad2(Wz, din_pad, half), pad2(Wh, din_pad, half)], axis=1)
    bcat = jnp.concatenate([pad2(bz, 1, half), pad2(bh, 1, half)], axis=1)
    Ucat = jnp.concatenate([pad2(Uz, Hp, half), pad2(Uh, Hp, half)], axis=1)
    return Wcat.astype(mxu_dtype), bcat.astype(jnp.float32), Ucat.astype(mxu_dtype)


def qligru_forward(x, layer_params, acts, drops, *,
                   time_block=None, batch_chunks=1, mxu_dtype=jnp.bfloat16):
    """x: (T, B, D) f32. layer_params: list of (Wh, bh, Wz, bz, Uh, Uz).

    batch_chunks > 1 is only useful on multi-TensorCore parts (v7x) with B>=16:
    each chunk becomes one row of the "parallel" grid axis with its own hidden
    state; on a single-core chip keep it at 1 (chunks would serialise).
    """
    T, B, D = x.shape
    n_layers = len(layer_params)
    hidden = [p[0].shape[1] for p in layer_params]
    h_last = hidden[-1]

    Hp = _round_up(max(hidden), 128)          # lane-dense hidden storage width

    nb = max(1, int(batch_chunks))
    Bc = _round_up(pl.cdiv(B, nb), 8)         # sublane-aligned rows per chunk
    Bp = nb * Bc

    # per-layer static metadata: gate packing (z|h share one 128-lane tile
    # whenever 2H <= 128), gate width, drop scale.
    layer_meta, gate_cols, dins = [], [], []
    din = D
    for H, act, dr in zip(hidden, acts, drops):
        packed = (2 * H <= 128) and (Hp == 128)
        Gl = Hp if packed else 2 * Hp
        layer_meta.append((act, 1.0 - float(dr), H, Gl, bool(packed)))
        gate_cols.append(Gl)
        dins.append(din)
        din = Hp
    Gmax = max(gate_cols)

    def vmem_bytes(tt):
        itms = jnp.dtype(mxu_dtype).itemsize
        blk = 2 * tt * Bc * D * 4 + 2 * tt * Bc * Hp * 4        # in/out double buffers
        wts = sum(d * g * itms + g * 4 + Hp * g * itms
                  for d, g in zip(dins, gate_cols))             # resident weights
        scr = (n_layers * Bc * Hp * 4                           # hidden states
               + tt * Bc * Gmax * 4 + tt * Bc * Hp * 4)         # wx / inter-layer
        return blk + wts + scr

    cap = _vmem_capacity_bytes()
    if time_block is None:
        # auto-size the time block to the generation's VMEM (v6e/v5e: big
        # blocks to amortise grid-step overhead; v7x: smaller 64 MiB budget).
        budget = min(max(cap // 3, 8 * 2 ** 20), 48 * 2 ** 20)
        TT = min(8, T)
        for cand in (512, 256, 128, 64, 32, 16, 8):
            tt = min(cand, T)
            if vmem_bytes(tt) <= budget:
                TT = tt
                break
    else:
        TT = min(int(time_block), T)
    TT = max(TT, 1)
    T_pad = _round_up(T, TT)

    # pad (time, batch) with zeros; trailing padded steps/rows are trimmed.
    # Layout: (chunk, time*rows, feat), (t, b) flattened onto the sublane axis.
    x_p = jnp.pad(x, ((0, T_pad - T), (0, Bp - B), (0, 0)))
    x_p = (x_p.reshape(T_pad, nb, Bc, D).transpose(1, 0, 2, 3)
              .reshape(nb, T_pad * Bc, D))

    packed_w = []
    for (Wh, bh, Wz, bz, Uh, Uz), d, Gl in zip(layer_params, dins, gate_cols):
        packed_w += list(_pack_layer(Wh, bh, Wz, bz, Uh, Uz, d, Hp, Gl, mxu_dtype))

    kernel = functools.partial(
        qligru_fused_kernel, n_layers=n_layers, TT=TT, Bc=Bc, Hp=Hp,
        layer_meta=tuple(layer_meta), mxu_dtype=mxu_dtype)

    # Weights: single VMEM-resident copy, no per-step double buffering.
    weight_specs = [pl.BlockSpec(memory_space=pltpu.MemorySpace.VMEM)
                    for _ in packed_w]

    vmem_limit = int(min(max(2 * vmem_bytes(TT), 32 * 2 ** 20),
                         min(cap, 64 * 2 ** 20)))

    out = pl.pallas_call(
        kernel,
        out_shape=jax.ShapeDtypeStruct((nb, T_pad * Bc, Hp), jnp.float32),
        grid=(nb, T_pad // TT),
        in_specs=[pl.BlockSpec((None, TT * Bc, D), lambda bc, tb: (bc, tb, 0))]
                 + weight_specs,
        out_specs=pl.BlockSpec((None, TT * Bc, Hp), lambda bc, tb: (bc, tb, 0)),
        scratch_shapes=(
            [pltpu.VMEM((Bc, Hp), jnp.float32) for _ in range(n_layers)]  # h per layer
            + [pltpu.VMEM((TT * Bc, Gmax), jnp.float32),                  # wx block
               pltpu.VMEM((TT * Bc, Hp), jnp.float32)]),                  # inter-layer act
        compiler_params=pltpu.CompilerParams(
            dimension_semantics=("parallel", "arbitrary"),   # chunks ||, time serial
            vmem_limit_bytes=vmem_limit),
    )(x_p, *packed_w)

    out = (out.reshape(nb, T_pad, Bc, Hp).transpose(1, 0, 2, 3)
              .reshape(T_pad, Bp, Hp))
    return out[:T, :B, :h_last]


# ----------------------------------------------------------------------------
# Pure-JAX reference (mirrors QliGRU.forward for the chosen options).
# mxu_dtype=None -> exact f32; mxu_dtype=bf16 -> same operand rounding policy
# as the kernel's default MXU path (f32 accumulation, f32 gate math).
# ----------------------------------------------------------------------------
def _mm(a, w, mxu_dtype):
    if mxu_dtype is None:
        return jnp.dot(a, w, preferred_element_type=jnp.float32)
    return jnp.dot(a.astype(mxu_dtype), w.astype(mxu_dtype),
                   preferred_element_type=jnp.float32)


def ligru_layer_ref(x, Wh, bh, Wz, bz, Uh, Uz, *, act_type="relu", drop=0.0,
                    mxu_dtype=None):
    T, B, _ = x.shape
    H = Wh.shape[1]
    wh_out = _mm(x, Wh, mxu_dtype) + bh
    wz_out = _mm(x, Wz, mxu_dtype) + bz
    h = jnp.zeros((B, H), jnp.float32)
    hs = []
    for k in range(T):
        zt = jax.nn.sigmoid(wz_out[k] + _mm(h, Uz, mxu_dtype))
        at = wh_out[k] + _mm(h, Uh, mxu_dtype)
        hcand = _apply_act(at, act_type) * (1.0 - drop)
        h = zt * h + (1.0 - zt) * hcand
        hs.append(h)
    return jnp.stack(hs)


def qligru_forward_ref(x, layer_params, acts, drops, mxu_dtype=None):
    cur = x
    for (Wh, bh, Wz, bz, Uh, Uz), act, dr in zip(layer_params, acts, drops):
        cur = ligru_layer_ref(cur, Wh, bh, Wz, bz, Uh, Uz,
                              act_type=act, drop=dr, mxu_dtype=mxu_dtype)
    return cur


# ----------------------------------------------------------------------------
# Demo / self-check
# ----------------------------------------------------------------------------
if __name__ == "__main__":
    # small shapes consistent with the module (all feature dims divisible by 4)
    T, B, D = 8, 4, 16
    ligru_lay = [32, 32]
    ligru_act = ["relu", "relu"]
    ligru_drop = [0.0, 0.0]

    key = jax.random.PRNGKey(0)
    kx, kparams = jax.random.split(key)
    x = jax.random.normal(kx, (T, B, D), dtype=jnp.float32)

    layer_params = []
    current_input = D
    for H in ligru_lay:
        k0, k1, k2, k3, kparams = jax.random.split(kparams, 5)
        Wh, bh = init_quaternion_linear(k0, current_input, H, bias=True)
        Wz, bz = init_quaternion_linear(k1, current_input, H, bias=True)
        Uh, _ = init_quaternion_linear(k2, H, H, bias=False)
        Uz, _ = init_quaternion_linear(k3, H, H, bias=False)
        layer_params.append((Wh, bh, Wz, bz, Uh, Uz))
        current_input = H

    # (1) exact-semantics check: f32-MXU kernel vs pure f32 reference
    out_f32 = jax.block_until_ready(
        qligru_forward(x, layer_params, ligru_act, ligru_drop,
                       mxu_dtype=jnp.float32))
    ref_f32 = jax.block_until_ready(
        qligru_forward_ref(x, layer_params, ligru_act, ligru_drop))
    assert out_f32.shape == (T, B, ligru_lay[-1]), out_f32.shape
    assert jnp.allclose(out_f32, ref_f32, atol=1e-4, rtol=1e-4), (
        "f32 mismatch vs reference: max abs err = %e"
        % float(jnp.max(jnp.abs(out_f32 - ref_f32))))

    # (2) default bf16-MXU path vs a reference with the same operand rounding
    out_bf = jax.block_until_ready(
        qligru_forward(x, layer_params, ligru_act, ligru_drop))
    ref_bf = jax.block_until_ready(
        qligru_forward_ref(x, layer_params, ligru_act, ligru_drop,
                           mxu_dtype=jnp.bfloat16))
    assert out_bf.shape == (T, B, ligru_lay[-1]), out_bf.shape
    assert jnp.allclose(out_bf, ref_bf, atol=2e-3, rtol=2e-3), (
        "bf16 mismatch vs mixed-precision reference: max abs err = %e"
        % float(jnp.max(jnp.abs(out_bf - ref_bf))))

    print("KERNEL_OK")
</pallas_src>

<mosaic_0001>
module attributes {stable_mosaic.version = 11 : i64} {
  func.func @qligru_fused_kernel(%arg0: i32, %arg1: i32, %arg2: memref<1x64x16xf32, #tpu.memory_space<vmem>>, %arg3: memref<16x128xf32, #tpu.memory_space<vmem>>, %arg4: memref<1x128xf32, #tpu.memory_space<vmem>>, %arg5: memref<128x128xf32, #tpu.memory_space<vmem>>, %arg6: memref<128x128xf32, #tpu.memory_space<vmem>>, %arg7: memref<1x128xf32, #tpu.memory_space<vmem>>, %arg8: memref<128x128xf32, #tpu.memory_space<vmem>>, %arg9: memref<1x64x128xf32, #tpu.memory_space<vmem>>, %arg10: memref<8x128xf32, #tpu.memory_space<vmem>>, %arg11: memref<8x128xf32, #tpu.memory_space<vmem>>, %arg12: memref<64x128xf32, #tpu.memory_space<vmem>>, %arg13: memref<64x128xf32, #tpu.memory_space<vmem>>) attributes {dimension_semantics = [#tpu.dimension_semantics<parallel>, #tpu.dimension_semantics<arbitrary>], iteration_bounds = array<i64: 1, 1>, scalar_prefetch = 0 : i64, scratch_operands = 4 : i64, tpu.core_type = #tpu.core_type<tc>, window_params = [{transform_indices = @transform_0, window_bounds = array<i64: 1, 64, 16>}, {pipeline_mode = #tpu.pipeline_mode<synchronous>, transform_indices = @transform_1, window_bounds = array<i64: 16, 128>}, {pipeline_mode = #tpu.pipeline_mode<synchronous>, transform_indices = @transform_2, window_bounds = array<i64: 1, 128>}, {pipeline_mode = #tpu.pipeline_mode<synchronous>, transform_indices = @transform_3, window_bounds = array<i64: 128, 128>}, {pipeline_mode = #tpu.pipeline_mode<synchronous>, transform_indices = @transform_4, window_bounds = array<i64: 128, 128>}, {pipeline_mode = #tpu.pipeline_mode<synchronous>, transform_indices = @transform_5, window_bounds = array<i64: 1, 128>}, {pipeline_mode = #tpu.pipeline_mode<synchronous>, transform_indices = @transform_6, window_bounds = array<i64: 128, 128>}, {transform_indices = @transform_7, window_bounds = array<i64: 1, 64, 128>}]} {
    %c0_i32 = arith.constant 0 : i32
    %0 = arith.cmpi eq, %arg1, %c0_i32 : i32
    %1 = arith.extui %0 : i1 to i32
    %c0_i32_0 = arith.constant 0 : i32
    %2 = arith.cmpi ne, %1, %c0_i32_0 : i32
    scf.if %2 {
      %cst_192 = arith.constant 0.000000e+00 : f32
      %386 = vector.broadcast %cst_192 : f32 to vector<8x128xf32>
      %c0_193 = arith.constant 0 : index
      %c0_194 = arith.constant 0 : index
      %387 = vector.load %arg10[%c0_193, %c0_194] : memref<8x128xf32, #tpu.memory_space<vmem>>, vector<8x128xf32>
      tpu.vector_store %arg10[%c0_193, %c0_194], %386 {strides = array<i32>} : memref<8x128xf32, #tpu.memory_space<vmem>>, vector<8x128xf32>,
      %cst_195 = arith.constant 0.000000e+00 : f32
      %388 = vector.broadcast %cst_195 : f32 to vector<8x128xf32>
      %c0_196 = arith.constant 0 : index
      %c0_197 = arith.constant 0 : index
      %389 = vector.load %arg11[%c0_196, %c0_197] : memref<8x128xf32, #tpu.memory_space<vmem>>, vector<8x128xf32>
      tpu.vector_store %arg11[%c0_196, %c0_197], %388 {strides = array<i32>} : memref<8x128xf32, #tpu.memory_space<vmem>>, vector<8x128xf32>,
    } else {
    }
    %c0 = arith.constant 0 : index
    %c0_1 = arith.constant 0 : index
    %c0_2 = arith.constant 0 : index
    %3 = vector.load %arg2[%c0, %c0_1, %c0_2] : memref<1x64x16xf32, #tpu.memory_space<vmem>>, vector<1x64x16xf32>
    %4 = vector.shape_cast %3 : vector<1x64x16xf32> to vector<64x16xf32>
    %c0_3 = arith.constant 0 : index
    %c0_4 = arith.constant 0 : index
    %5 = vector.load %arg3[%c0_3, %c0_4] : memref<16x128xf32, #tpu.memory_space<vmem>>, vector<16x128xf32>
    %cst = arith.constant dense<0.000000e+00> : vector<64x128xf32>
    %6 = tpu.matmul %4, %5, %cst {dimension_numbers = #tpu.dot_dimension_numbers<[1], [0], [0], [1], [0, 0, 1, 1], [], []>} : vector<64x16xf32>, vector<16x128xf32>, vector<64x128xf32> -> vector<64x128xf32>
    %c0_5 = arith.constant 0 : index
    %c0_6 = arith.constant 0 : index
    %7 = vector.load %arg4[%c0_5, %c0_6] : memref<1x128xf32, #tpu.memory_space<vmem>>, vector<1x128xf32>
    %8 = vector.broadcast %7 : vector<1x128xf32> to vector<64x128xf32>
    %9 = arith.addf %6, %8 : vector<64x128xf32>
    %c0_7 = arith.constant 0 : index
    %c0_8 = arith.constant 0 : index
    %10 = vector.load %arg12[%c0_7, %c0_8] : memref<64x128xf32, #tpu.memory_space<vmem>>, vector<64x128xf32>
    tpu.vector_store %arg12[%c0_7, %c0_8], %9 {strides = array<i32>} : memref<64x128xf32, #tpu.memory_space<vmem>>, vector<64x128xf32>,
    %11 = tpu.iota {dimensions = array<i32: 1>} : vector<8x128xi32>
    %c32_i32 = arith.constant 32 : i32
    %12 = vector.broadcast %c32_i32 : i32 to vector<8x128xi32>
    %13 = arith.cmpi slt, %11, %12 : vector<8x128xi32>
    %cst_9 = arith.constant 1.000000e+00 : f32
    %cst_10 = arith.constant 0.000000e+00 : f32
    %14 = vector.broadcast %cst_9 : f32 to vector<8x128xf32>
    %15 = vector.broadcast %cst_10 : f32 to vector<8x128xf32>
    %16 = arith.select %13, %14, %15 : vector<8x128xi1>, vector<8x128xf32>
    %c0_11 = arith.constant 0 : index
    %c0_12 = arith.constant 0 : index
    %17 = vector.load %arg10[%c0_11, %c0_12] : memref<8x128xf32, #tpu.memory_space<vmem>>, vector<8x128xf32>
    %c0_i32_13 = arith.constant 0 : i32
    %c8_i32 = arith.constant 8 : i32
    %18 = arith.muli %c0_i32_13, %c8_i32 : i32
    %19 = tpu.assume_multiple %18, 8 : i32
    %20 = arith.index_cast %19 : i32 to index
    %c0_14 = arith.constant 0 : index
    %21 = vector.load %arg12[%20, %c0_14] : memref<64x128xf32, #tpu.memory_space<vmem>>, vector<8x128xf32>
    %c0_15 = arith.constant 0 : index
    %c0_16 = arith.constant 0 : index
    %22 = vector.load %arg5[%c0_15, %c0_16] : memref<128x128xf32, #tpu.memory_space<vmem>>, vector<128x128xf32>
    %cst_17 = arith.constant dense<0.000000e+00> : vector<8x128xf32>
    %23 = tpu.matmul %17, %22, %cst_17 {dimension_numbers = #tpu.dot_dimension_numbers<[1], [0], [0], [1], [0, 0, 1, 1], [], []>} : vector<8x128xf32>, vector<128x128xf32>, vector<8x128xf32> -> vector<8x128xf32>
    %24 = arith.addf %21, %23 : vector<8x128xf32>
    %25 = arith.negf %24 : vector<8x128xf32>
    %26 = math.exp %25 : vector<8x128xf32>
    %cst_18 = arith.constant 1.000000e+00 : f32
    %27 = vector.broadcast %cst_18 : f32 to vector<8x128xf32>
    %28 = arith.addf %27, %26 : vector<8x128xf32>
    %29 = arith.divf %27, %28 : vector<8x128xf32>
    %c64_i32 = arith.constant 64 : i32
    %30 = tpu.dynamic_rotate %24 by %c64_i32 dim 1 : vector<8x128xf32>, i32 -> vector<8x128xf32>
    %cst_19 = arith.constant 0.000000e+00 : f32
    %31 = vector.broadcast %cst_19 : f32 to vector<8x128xf32>
    %32 = arith.maximumf %30, %31 : vector<8x128xf32>
    %33 = arith.mulf %32, %16 : vector<8x128xf32>
    %34 = arith.subf %17, %33 : vector<8x128xf32>
    %35 = arith.mulf %29, %34 : vector<8x128xf32>
    %36 = arith.addf %33, %35 : vector<8x128xf32>
    %37 = arith.index_cast %19 : i32 to index
    %c0_20 = arith.constant 0 : index
    %38 = vector.load %arg13[%37, %c0_20] : memref<64x128xf32, #tpu.memory_space<vmem>>, vector<8x128xf32>
    tpu.vector_store %arg13[%37, %c0_20], %36 {strides = array<i32>} : memref<64x128xf32, #tpu.memory_space<vmem>>, vector<8x128xf32>,
    %c1_i32 = arith.constant 1 : i32
    %c8_i32_21 = arith.constant 8 : i32
    %39 = arith.muli %c1_i32, %c8_i32_21 : i32
    %40 = tpu.assume_multiple %39, 8 : i32
    %41 = arith.index_cast %40 : i32 to index
    %c0_22 = arith.constant 0 : index
    %42 = vector.load %arg12[%41, %c0_22] : memref<64x128xf32, #tpu.memory_space<vmem>>, vector<8x128xf32>
    %c0_23 = arith.constant 0 : index
    %c0_24 = arith.constant 0 : index
    %43 = vector.load %arg5[%c0_23, %c0_24] : memref<128x128xf32, #tpu.memory_space<vmem>>, vector<128x128xf32>
    %cst_25 = arith.constant dense<0.000000e+00> : vector<8x128xf32>
    %44 = tpu.matmul %36, %43, %cst_25 {dimension_numbers = #tpu.dot_dimension_numbers<[1], [0], [0], [1], [0, 0, 1, 1], [], []>} : vector<8x128xf32>, vector<128x128xf32>, vector<8x128xf32> -> vector<8x128xf32>
    %45 = arith.addf %42, %44 : vector<8x128xf32>
    %46 = arith.negf %45 : vector<8x128xf32>
    %47 = math.exp %46 : vector<8x128xf32>
    %cst_26 = arith.constant 1.000000e+00 : f32
    %48 = vector.broadcast %cst_26 : f32 to vector<8x128xf32>
    %49 = arith.addf %48, %47 : vector<8x128xf32>
    %50 = arith.divf %48, %49 : vector<8x128xf32>
    %c64_i32_27 = arith.constant 64 : i32
    %51 = tpu.dynamic_rotate %45 by %c64_i32_27 dim 1 : vector<8x128xf32>, i32 -> vector<8x128xf32>
    %cst_28 = arith.constant 0.000000e+00 : f32
    %52 = vector.broadcast %cst_28 : f32 to vector<8x128xf32>
    %53 = arith.maximumf %51, %52 : vector<8x128xf32>
    %54 = arith.mulf %53, %16 : vector<8x128xf32>
    %55 = arith.subf %36, %54 : vector<8x128xf32>
    %56 = arith.mulf %50, %55 : vector<8x128xf32>
    %57 = arith.addf %54, %56 : vector<8x128xf32>
    %58 = arith.index_cast %40 : i32 to index
    %c0_29 = arith.constant 0 : index
    %59 = vector.load %arg13[%58, %c0_29] : memref<64x128xf32, #tpu.memory_space<vmem>>, vector<8x128xf32>
    tpu.vector_store %arg13[%58, %c0_29], %57 {strides = array<i32>} : memref<64x128xf32, #tpu.memory_space<vmem>>, vector<8x128xf32>,
    %c2_i32 = arith.constant 2 : i32
    %c8_i32_30 = arith.constant 8 : i32
    %60 = arith.muli %c2_i32, %c8_i32_30 : i32
    %61 = tpu.assume_multiple %60, 8 : i32
    %62 = arith.index_cast %61 : i32 to index
    %c0_31 = arith.constant 0 : index
    %63 = vector.load %arg12[%62, %c0_31] : memref<64x128xf32, #tpu.memory_space<vmem>>, vector<8x128xf32>
    %c0_32 = arith.constant 0 : index
    %c0_33 = arith.constant 0 : index
    %64 = vector.load %arg5[%c0_32, %c0_33] : memref<128x128xf32, #tpu.memory_space<vmem>>, vector<128x128xf32>
    %cst_34 = arith.constant dense<0.000000e+00> : vector<8x128xf32>
    %65 = tpu.matmul %57, %64, %cst_34 {dimension_numbers = #tpu.dot_dimension_numbers<[1], [0], [0], [1], [0, 0, 1, 1], [], []>} : vector<8x128xf32>, vector<128x128xf32>, vector<8x128xf32> -> vector<8x128xf32>
    %66 = arith.addf %63, %65 : vector<8x128xf32>
    %67 = arith.negf %66 : vector<8x128xf32>
    %68 = math.exp %67 : vector<8x128xf32>
    %cst_35 = arith.constant 1.000000e+00 : f32
    %69 = vector.broadcast %cst_35 : f32 to vector<8x128xf32>
    %70 = arith.addf %69, %68 : vector<8x128xf32>
    %71 = arith.divf %69, %70 : vector<8x128xf32>
    %c64_i32_36 = arith.constant 64 : i32
    %72 = tpu.dynamic_rotate %66 by %c64_i32_36 dim 1 : vector<8x128xf32>, i32 -> vector<8x128xf32>
    %cst_37 = arith.constant 0.000000e+00 : f32
    %73 = vector.broadcast %cst_37 : f32 to vector<8x128xf32>
    %74 = arith.maximumf %72, %73 : vector<8x128xf32>
    %75 = arith.mulf %74, %16 : vector<8x128xf32>
    %76 = arith.subf %57, %75 : vector<8x128xf32>
    %77 = arith.mulf %71, %76 : vector<8x128xf32>
    %78 = arith.addf %75, %77 : vector<8x128xf32>
    %79 = arith.index_cast %61 : i32 to index
    %c0_38 = arith.constant 0 : index
    %80 = vector.load %arg13[%79, %c0_38] : memref<64x128xf32, #tpu.memory_space<vmem>>, vector<8x128xf32>
    tpu.vector_store %arg13[%79, %c0_38], %78 {strides = array<i32>} : memref<64x128xf32, #tpu.memory_space<vmem>>, vector<8x128xf32>,
    %c3_i32 = arith.constant 3 : i32
    %c8_i32_39 = arith.constant 8 : i32
    %81 = arith.muli %c3_i32, %c8_i32_39 : i32
    %82 = tpu.assume_multiple %81, 8 : i32
    %83 = arith.index_cast %82 : i32 to index
    %c0_40 = arith.constant 0 : index
    %84 = vector.load %arg12[%83, %c0_40] : memref<64x128xf32, #tpu.memory_space<vmem>>, vector<8x128xf32>
    %c0_41 = arith.constant 0 : index
    %c0_42 = arith.constant 0 : index
    %85 = vector.load %arg5[%c0_41, %c0_42] : memref<128x128xf32, #tpu.memory_space<vmem>>, vector<128x128xf32>
    %cst_43 = arith.constant dense<0.000000e+00> : vector<8x128xf32>
    %86 = tpu.matmul %78, %85, %cst_43 {dimension_numbers = #tpu.dot_dimension_numbers<[1], [0], [0], [1], [0, 0, 1, 1], [], []>} : vector<8x128xf32>, vector<128x128xf32>, vector<8x128xf32> -> vector<8x128xf32>
    %87 = arith.addf %84, %86 : vector<8x128xf32>
    %88 = arith.negf %87 : vector<8x128xf32>
    %89 = math.exp %88 : vector<8x128xf32>
    %cst_44 = arith.constant 1.000000e+00 : f32
    %90 = vector.broadcast %cst_44 : f32 to vector<8x128xf32>
    %91 = arith.addf %90, %89 : vector<8x128xf32>
    %92 = arith.divf %90, %91 : vector<8x128xf32>
    %c64_i32_45 = arith.constant 64 : i32
    %93 = tpu.dynamic_rotate %87 by %c64_i32_45 dim 1 : vector<8x128xf32>, i32 -> vector<8x128xf32>
    %cst_46 = arith.constant 0.000000e+00 : f32
    %94 = vector.broadcast %cst_46 : f32 to vector<8x128xf32>
    %95 = arith.maximumf %93, %94 : vector<8x128xf32>
    %96 = arith.mulf %95, %16 : vector<8x128xf32>
    %97 = arith.subf %78, %96 : vector<8x128xf32>
    %98 = arith.mulf %92, %97 : vector<8x128xf32>
    %99 = arith.addf %96, %98 : vector<8x128xf32>
    %100 = arith.index_cast %82 : i32 to index
    %c0_47 = arith.constant 0 : index
    %101 = vector.load %arg13[%100, %c0_47] : memref<64x128xf32, #tpu.memory_space<vmem>>, vector<8x128xf32>
    tpu.vector_store %arg13[%100, %c0_47], %99 {strides = array<i32>} : memref<64x128xf32, #tpu.memory_space<vmem>>, vector<8x128xf32>,
    %c4_i32 = arith.constant 4 : i32
    %c8_i32_48 = arith.constant 8 : i32
    %102 = arith.muli %c4_i32, %c8_i32_48 : i32
    %103 = tpu.assume_multiple %102, 8 : i32
    %104 = arith.index_cast %103 : i32 to index
    %c0_49 = arith.constant 0 : index
    %105 = vector.load %arg12[%104, %c0_49] : memref<64x128xf32, #tpu.memory_space<vmem>>, vector<8x128xf32>
    %c0_50 = arith.constant 0 : index
    %c0_51 = arith.constant 0 : index
    %106 = vector.load %arg5[%c0_50, %c0_51] : memref<128x128xf32, #tpu.memory_space<vmem>>, vector<128x128xf32>
    %cst_52 = arith.constant dense<0.000000e+00> : vector<8x128xf32>
    %107 = tpu.matmul %99, %106, %cst_52 {dimension_numbers = #tpu.dot_dimension_numbers<[1], [0], [0], [1], [0, 0, 1, 1], [], []>} : vector<8x128xf32>, vector<128x128xf32>, vector<8x128xf32> -> vector<8x128xf32>
    %108 = arith.addf %105, %107 : vector<8x128xf32>
    %109 = arith.negf %108 : vector<8x128xf32>
    %110 = math.exp %109 : vector<8x128xf32>
    %cst_53 = arith.constant 1.000000e+00 : f32
    %111 = vector.broadcast %cst_53 : f32 to vector<8x128xf32>
    %112 = arith.addf %111, %110 : vector<8x128xf32>
    %113 = arith.divf %111, %112 : vector<8x128xf32>
    %c64_i32_54 = arith.constant 64 : i32
    %114 = tpu.dynamic_rotate %108 by %c64_i32_54 dim 1 : vector<8x128xf32>, i32 -> vector<8x128xf32>
    %cst_55 = arith.constant 0.000000e+00 : f32
    %115 = vector.broadcast %cst_55 : f32 to vector<8x128xf32>
    %116 = arith.maximumf %114, %115 : vector<8x128xf32>
    %117 = arith.mulf %116, %16 : vector<8x128xf32>
    %118 = arith.subf %99, %117 : vector<8x128xf32>
    %119 = arith.mulf %113, %118 : vector<8x128xf32>
    %120 = arith.addf %117, %119 : vector<8x128xf32>
    %121 = arith.index_cast %103 : i32 to index
    %c0_56 = arith.constant 0 : index
    %122 = vector.load %arg13[%121, %c0_56] : memref<64x128xf32, #tpu.memory_space<vmem>>, vector<8x128xf32>
    tpu.vector_store %arg13[%121, %c0_56], %120 {strides = array<i32>} : memref<64x128xf32, #tpu.memory_space<vmem>>, vector<8x128xf32>,
    %c5_i32 = arith.constant 5 : i32
    %c8_i32_57 = arith.constant 8 : i32
    %123 = arith.muli %c5_i32, %c8_i32_57 : i32
    %124 = tpu.assume_multiple %123, 8 : i32
    %125 = arith.index_cast %124 : i32 to index
    %c0_58 = arith.constant 0 : index
    %126 = vector.load %arg12[%125, %c0_58] : memref<64x128xf32, #tpu.memory_space<vmem>>, vector<8x128xf32>
    %c0_59 = arith.constant 0 : index
    %c0_60 = arith.constant 0 : index
    %127 = vector.load %arg5[%c0_59, %c0_60] : memref<128x128xf32, #tpu.memory_space<vmem>>, vector<128x128xf32>
    %cst_61 = arith.constant dense<0.000000e+00> : vector<8x128xf32>
    %128 = tpu.matmul %120, %127, %cst_61 {dimension_numbers = #tpu.dot_dimension_numbers<[1], [0], [0], [1], [0, 0, 1, 1], [], []>} : vector<8x128xf32>, vector<128x128xf32>, vector<8x128xf32> -> vector<8x128xf32>
    %129 = arith.addf %126, %128 : vector<8x128xf32>
    %130 = arith.negf %129 : vector<8x128xf32>
    %131 = math.exp %130 : vector<8x128xf32>
    %cst_62 = arith.constant 1.000000e+00 : f32
    %132 = vector.broadcast %cst_62 : f32 to vector<8x128xf32>
    %133 = arith.addf %132, %131 : vector<8x128xf32>
    %134 = arith.divf %132, %133 : vector<8x128xf32>
    %c64_i32_63 = arith.constant 64 : i32
    %135 = tpu.dynamic_rotate %129 by %c64_i32_63 dim 1 : vector<8x128xf32>, i32 -> vector<8x128xf32>
    %cst_64 = arith.constant 0.000000e+00 : f32
    %136 = vector.broadcast %cst_64 : f32 to vector<8x128xf32>
    %137 = arith.maximumf %135, %136 : vector<8x128xf32>
    %138 = arith.mulf %137, %16 : vector<8x128xf32>
    %139 = arith.subf %120, %138 : vector<8x128xf32>
    %140 = arith.mulf %134, %139 : vector<8x128xf32>
    %141 = arith.addf %138, %140 : vector<8x128xf32>
    %142 = arith.index_cast %124 : i32 to index
    %c0_65 = arith.constant 0 : index
    %143 = vector.load %arg13[%142, %c0_65] : memref<64x128xf32, #tpu.memory_space<vmem>>, vector<8x128xf32>
    tpu.vector_store %arg13[%142, %c0_65], %141 {strides = array<i32>} : memref<64x128xf32, #tpu.memory_space<vmem>>, vector<8x128xf32>,
    %c6_i32 = arith.constant 6 : i32
    %c8_i32_66 = arith.constant 8 : i32
    %144 = arith.muli %c6_i32, %c8_i32_66 : i32
    %145 = tpu.assume_multiple %144, 8 : i32
    %146 = arith.index_cast %145 : i32 to index
    %c0_67 = arith.constant 0 : index
    %147 = vector.load %arg12[%146, %c0_67] : memref<64x128xf32, #tpu.memory_space<vmem>>, vector<8x128xf32>
    %c0_68 = arith.constant 0 : index
    %c0_69 = arith.constant 0 : index
    %148 = vector.load %arg5[%c0_68, %c0_69] : memref<128x128xf32, #tpu.memory_space<vmem>>, vector<128x128xf32>
    %cst_70 = arith.constant dense<0.000000e+00> : vector<8x128xf32>
    %149 = tpu.matmul %141, %148, %cst_70 {dimension_numbers = #tpu.dot_dimension_numbers<[1], [0], [0], [1], [0, 0, 1, 1], [], []>} : vector<8x128xf32>, vector<128x128xf32>, vector<8x128xf32> -> vector<8x128xf32>
    %150 = arith.addf %147, %149 : vector<8x128xf32>
    %151 = arith.negf %150 : vector<8x128xf32>
    %152 = math.exp %151 : vector<8x128xf32>
    %cst_71 = arith.constant 1.000000e+00 : f32
    %153 = vector.broadcast %cst_71 : f32 to vector<8x128xf32>
    %154 = arith.addf %153, %152 : vector<8x128xf32>
    %155 = arith.divf %153, %154 : vector<8x128xf32>
    %c64_i32_72 = arith.constant 64 : i32
    %156 = tpu.dynamic_rotate %150 by %c64_i32_72 dim 1 : vector<8x128xf32>, i32 -> vector<8x128xf32>
    %cst_73 = arith.constant 0.000000e+00 : f32
    %157 = vector.broadcast %cst_73 : f32 to vector<8x128xf32>
    %158 = arith.maximumf %156, %157 : vector<8x128xf32>
    %159 = arith.mulf %158, %16 : vector<8x128xf32>
    %160 = arith.subf %141, %159 : vector<8x128xf32>
    %161 = arith.mulf %155, %160 : vector<8x128xf32>
    %162 = arith.addf %159, %161 : vector<8x128xf32>
    %163 = arith.index_cast %145 : i32 to index
    %c0_74 = arith.constant 0 : index
    %164 = vector.load %arg13[%163, %c0_74] : memref<64x128xf32, #tpu.memory_space<vmem>>, vector<8x128xf32>
    tpu.vector_store %arg13[%163, %c0_74], %162 {strides = array<i32>} : memref<64x128xf32, #tpu.memory_space<vmem>>, vector<8x128xf32>,
    %c7_i32 = arith.constant 7 : i32
    %c8_i32_75 = arith.constant 8 : i32
    %165 = arith.muli %c7_i32, %c8_i32_75 : i32
    %166 = tpu.assume_multiple %165, 8 : i32
    %167 = arith.index_cast %166 : i32 to index
    %c0_76 = arith.constant 0 : index
    %168 = vector.load %arg12[%167, %c0_76] : memref<64x128xf32, #tpu.memory_space<vmem>>, vector<8x128xf32>
    %c0_77 = arith.constant 0 : index
    %c0_78 = arith.constant 0 : index
    %169 = vector.load %arg5[%c0_77, %c0_78] : memref<128x128xf32, #tpu.memory_space<vmem>>, vector<128x128xf32>
    %cst_79 = arith.constant dense<0.000000e+00> : vector<8x128xf32>
    %170 = tpu.matmul %162, %169, %cst_79 {dimension_numbers = #tpu.dot_dimension_numbers<[1], [0], [0], [1], [0, 0, 1, 1], [], []>} : vector<8x128xf32>, vector<128x128xf32>, vector<8x128xf32> -> vector<8x128xf32>
    %171 = arith.addf %168, %170 : vector<8x128xf32>
    %172 = arith.negf %171 : vector<8x128xf32>
    %173 = math.exp %172 : vector<8x128xf32>
    %cst_80 = arith.constant 1.000000e+00 : f32
    %174 = vector.broadcast %cst_80 : f32 to vector<8x128xf32>
    %175 = arith.addf %174, %173 : vector<8x128xf32>
    %176 = arith.divf %174, %175 : vector<8x128xf32>
    %c64_i32_81 = arith.constant 64 : i32
    %177 = tpu.dynamic_rotate %171 by %c64_i32_81 dim 1 : vector<8x128xf32>, i32 -> vector<8x128xf32>
    %cst_82 = arith.constant 0.000000e+00 : f32
    %178 = vector.broadcast %cst_82 : f32 to vector<8x128xf32>
    %179 = arith.maximumf %177, %178 : vector<8x128xf32>
    %180 = arith.mulf %179, %16 : vector<8x128xf32>
    %181 = arith.subf %162, %180 : vector<8x128xf32>
    %182 = arith.mulf %176, %181 : vector<8x128xf32>
    %183 = arith.addf %180, %182 : vector<8x128xf32>
    %184 = arith.index_cast %166 : i32 to index
    %c0_83 = arith.constant 0 : index
    %185 = vector.load %arg13[%184, %c0_83] : memref<64x128xf32, #tpu.memory_space<vmem>>, vector<8x128xf32>
    tpu.vector_store %arg13[%184, %c0_83], %183 {strides = array<i32>} : memref<64x128xf32, #tpu.memory_space<vmem>>, vector<8x128xf32>,
    %c8_i32_84 = arith.constant 8 : i32
    %c0_85 = arith.constant 0 : index
    %c0_86 = arith.constant 0 : index
    %186 = vector.load %arg10[%c0_85, %c0_86] : memref<8x128xf32, #tpu.memory_space<vmem>>, vector<8x128xf32>
    tpu.vector_store %arg10[%c0_85, %c0_86], %183 {strides = array<i32>} : memref<8x128xf32, #tpu.memory_space<vmem>>, vector<8x128xf32>,
    %c0_87 = arith.constant 0 : index
    %c0_88 = arith.constant 0 : index
    %187 = vector.load %arg13[%c0_87, %c0_88] : memref<64x128xf32, #tpu.memory_space<vmem>>, vector<64x128xf32>
    %c0_89 = arith.constant 0 : index
    %c0_90 = arith.constant 0 : index
    %188 = vector.load %arg6[%c0_89, %c0_90] : memref<128x128xf32, #tpu.memory_space<vmem>>, vector<128x128xf32>
    %cst_91 = arith.constant dense<0.000000e+00> : vector<64x128xf32>
    %189 = tpu.matmul %187, %188, %cst_91 {dimension_numbers = #tpu.dot_dimension_numbers<[1], [0], [0], [1], [0, 0, 1, 1], [], []>} : vector<64x128xf32>, vector<128x128xf32>, vector<64x128xf32> -> vector<64x128xf32>
    %c0_92 = arith.constant 0 : index
    %c0_93 = arith.constant 0 : index
    %190 = vector.load %arg7[%c0_92, %c0_93] : memref<1x128xf32, #tpu.memory_space<vmem>>, vector<1x128xf32>
    %191 = vector.broadcast %190 : vector<1x128xf32> to vector<64x128xf32>
    %192 = arith.addf %189, %191 : vector<64x128xf32>
    %c0_94 = arith.constant 0 : index
    %c0_95 = arith.constant 0 : index
    %193 = vector.load %arg12[%c0_94, %c0_95] : memref<64x128xf32, #tpu.memory_space<vmem>>, vector<64x128xf32>
    tpu.vector_store %arg12[%c0_94, %c0_95], %192 {strides = array<i32>} : memref<64x128xf32, #tpu.memory_space<vmem>>, vector<64x128xf32>,
    %194 = tpu.iota {dimensions = array<i32: 1>} : vector<8x128xi32>
    %c32_i32_96 = arith.constant 32 : i32
    %195 = vector.broadcast %c32_i32_96 : i32 to vector<8x128xi32>
    %196 = arith.cmpi slt, %194, %195 : vector<8x128xi32>
    %cst_97 = arith.constant 1.000000e+00 : f32
    %cst_98 = arith.constant 0.000000e+00 : f32
    %197 = vector.broadcast %cst_97 : f32 to vector<8x128xf32>
    %198 = vector.broadcast %cst_98 : f32 to vector<8x128xf32>
    %199 = arith.select %196, %197, %198 : vector<8x128xi1>, vector<8x128xf32>
    %c0_99 = arith.constant 0 : index
    %c0_100 = arith.constant 0 : index
    %200 = vector.load %arg11[%c0_99, %c0_100] : memref<8x128xf32, #tpu.memory_space<vmem>>, vector<8x128xf32>
    %c0_i32_101 = arith.constant 0 : i32
    %c8_i32_102 = arith.constant 8 : i32
    %201 = arith.muli %c0_i32_101, %c8_i32_102 : i32
    %202 = tpu.assume_multiple %201, 8 : i32
    %203 = arith.index_cast %202 : i32 to index
    %c0_103 = arith.constant 0 : index
    %204 = vector.load %arg12[%203, %c0_103] : memref<64x128xf32, #tpu.memory_space<vmem>>, vector<8x128xf32>
    %c0_104 = arith.constant 0 : index
    %c0_105 = arith.constant 0 : index
    %205 = vector.load %arg8[%c0_104, %c0_105] : memref<128x128xf32, #tpu.memory_space<vmem>>, vector<128x128xf32>
    %cst_106 = arith.constant dense<0.000000e+00> : vector<8x128xf32>
    %206 = tpu.matmul %200, %205, %cst_106 {dimension_numbers = #tpu.dot_dimension_numbers<[1], [0], [0], [1], [0, 0, 1, 1], [], []>} : vector<8x128xf32>, vector<128x128xf32>, vector<8x128xf32> -> vector<8x128xf32>
    %207 = arith.addf %204, %206 : vector<8x128xf32>
    %208 = arith.negf %207 : vector<8x128xf32>
    %209 = math.exp %208 : vector<8x128xf32>
    %cst_107 = arith.constant 1.000000e+00 : f32
    %210 = vector.broadcast %cst_107 : f32 to vector<8x128xf32>
    %211 = arith.addf %210, %209 : vector<8x128xf32>
    %212 = arith.divf %210, %211 : vector<8x128xf32>
    %c64_i32_108 = arith.constant 64 : i32
    %213 = tpu.dynamic_rotate %207 by %c64_i32_108 dim 1 : vector<8x128xf32>, i32 -> vector<8x128xf32>
    %cst_109 = arith.constant 0.000000e+00 : f32
    %214 = vector.broadcast %cst_109 : f32 to vector<8x128xf32>
    %215 = arith.maximumf %213, %214 : vector<8x128xf32>
    %216 = arith.mulf %215, %199 : vector<8x128xf32>
    %217 = arith.subf %200, %216 : vector<8x128xf32>
    %218 = arith.mulf %212, %217 : vector<8x128xf32>
    %219 = arith.addf %216, %218 : vector<8x128xf32>
    %c0_110 = arith.constant 0 : index
    %220 = arith.index_cast %202 : i32 to index
    %c0_111 = arith.constant 0 : index
    %221 = vector.load %arg9[%c0_110, %220, %c0_111] : memref<1x64x128xf32, #tpu.memory_space<vmem>>, vector<1x8x128xf32>
    %222 = vector.shape_cast %221 : vector<1x8x128xf32> to vector<8x128xf32>
    %223 = vector.shape_cast %219 : vector<8x128xf32> to vector<1x8x128xf32>
    tpu.vector_store %arg9[%c0_110, %220, %c0_111], %223 {strides = array<i32>} : memref<1x64x128xf32, #tpu.memory_space<vmem>>, vector<1x8x128xf32>,
    %c1_i32_112 = arith.constant 1 : i32
    %c8_i32_113 = arith.constant 8 : i32
    %224 = arith.muli %c1_i32_112, %c8_i32_113 : i32
    %225 = tpu.assume_multiple %224, 8 : i32
    %226 = arith.index_cast %225 : i32 to index
    %c0_114 = arith.constant 0 : index
    %227 = vector.load %arg12[%226, %c0_114] : memref<64x128xf32, #tpu.memory_space<vmem>>, vector<8x128xf32>
    %c0_115 = arith.constant 0 : index
    %c0_116 = arith.constant 0 : index
    %228 = vector.load %arg8[%c0_115, %c0_116] : memref<128x128xf32, #tpu.memory_space<vmem>>, vector<128x128xf32>
    %cst_117 = arith.constant dense<0.000000e+00> : vector<8x128xf32>
    %229 = tpu.matmul %219, %228, %cst_117 {dimension_numbers = #tpu.dot_dimension_numbers<[1], [0], [0], [1], [0, 0, 1, 1], [], []>} : vector<8x128xf32>, vector<128x128xf32>, vector<8x128xf32> -> vector<8x128xf32>
    %230 = arith.addf %227, %229 : vector<8x128xf32>
    %231 = arith.negf %230 : vector<8x128xf32>
    %232 = math.exp %231 : vector<8x128xf32>
    %cst_118 = arith.constant 1.000000e+00 : f32
    %233 = vector.broadcast %cst_118 : f32 to vector<8x128xf32>
    %234 = arith.addf %233, %232 : vector<8x128xf32>
    %235 = arith.divf %233, %234 : vector<8x128xf32>
    %c64_i32_119 = arith.constant 64 : i32
    %236 = tpu.dynamic_rotate %230 by %c64_i32_119 dim 1 : vector<8x128xf32>, i32 -> vector<8x128xf32>
    %cst_120 = arith.constant 0.000000e+00 : f32
    %237 = vector.broadcast %cst_120 : f32 to vector<8x128xf32>
    %238 = arith.maximumf %236, %237 : vector<8x128xf32>
    %239 = arith.mulf %238, %199 : vector<8x128xf32>
    %240 = arith.subf %219, %239 : vector<8x128xf32>
    %241 = arith.mulf %235, %240 : vector<8x128xf32>
    %242 = arith.addf %239, %241 : vector<8x128xf32>
    %c0_121 = arith.constant 0 : index
    %243 = arith.index_cast %225 : i32 to index
    %c0_122 = arith.constant 0 : index
    %244 = vector.load %arg9[%c0_121, %243, %c0_122] : memref<1x64x128xf32, #tpu.memory_space<vmem>>, vector<1x8x128xf32>
    %245 = vector.shape_cast %244 : vector<1x8x128xf32> to vector<8x128xf32>
    %246 = vector.shape_cast %242 : vector<8x128xf32> to vector<1x8x128xf32>
    tpu.vector_store %arg9[%c0_121, %243, %c0_122], %246 {strides = array<i32>} : memref<1x64x128xf32, #tpu.memory_space<vmem>>, vector<1x8x128xf32>,
    %c2_i32_123 = arith.constant 2 : i32
    %c8_i32_124 = arith.constant 8 : i32
    %247 = arith.muli %c2_i32_123, %c8_i32_124 : i32
    %248 = tpu.assume_multiple %247, 8 : i32
    %249 = arith.index_cast %248 : i32 to index
    %c0_125 = arith.constant 0 : index
    %250 = vector.load %arg12[%249, %c0_125] : memref<64x128xf32, #tpu.memory_space<vmem>>, vector<8x128xf32>
    %c0_126 = arith.constant 0 : index
    %c0_127 = arith.constant 0 : index
    %251 = vector.load %arg8[%c0_126, %c0_127] : memref<128x128xf32, #tpu.memory_space<vmem>>, vector<128x128xf32>
    %cst_128 = arith.constant dense<0.000000e+00> : vector<8x128xf32>
    %252 = tpu.matmul %242, %251, %cst_128 {dimension_numbers = #tpu.dot_dimension_numbers<[1], [0], [0], [1], [0, 0, 1, 1], [], []>} : vector<8x128xf32>, vector<128x128xf32>, vector<8x128xf32> -> vector<8x128xf32>
    %253 = arith.addf %250, %252 : vector<8x128xf32>
    %254 = arith.negf %253 : vector<8x128xf32>
    %255 = math.exp %254 : vector<8x128xf32>
    %cst_129 = arith.constant 1.000000e+00 : f32
    %256 = vector.broadcast %cst_129 : f32 to vector<8x128xf32>
    %257 = arith.addf %256, %255 : vector<8x128xf32>
    %258 = arith.divf %256, %257 : vector<8x128xf32>
    %c64_i32_130 = arith.constant 64 : i32
    %259 = tpu.dynamic_rotate %253 by %c64_i32_130 dim 1 : vector<8x128xf32>, i32 -> vector<8x128xf32>
    %cst_131 = arith.constant 0.000000e+00 : f32
    %260 = vector.broadcast %cst_131 : f32 to vector<8x128xf32>
    %261 = arith.maximumf %259, %260 : vector<8x128xf32>
    %262 = arith.mulf %261, %199 : vector<8x128xf32>
    %263 = arith.subf %242, %262 : vector<8x128xf32>
    %264 = arith.mulf %258, %263 : vector<8x128xf32>
    %265 = arith.addf %262, %264 : vector<8x128xf32>
    %c0_132 = arith.constant 0 : index
    %266 = arith.index_cast %248 : i32 to index
    %c0_133 = arith.constant 0 : index
    %267 = vector.load %arg9[%c0_132, %266, %c0_133] : memref<1x64x128xf32, #tpu.memory_space<vmem>>, vector<1x8x128xf32>
    %268 = vector.shape_cast %267 : vector<1x8x128xf32> to vector<8x128xf32>
    %269 = vector.shape_cast %265 : vector<8x128xf32> to vector<1x8x128xf32>
    tpu.vector_store %arg9[%c0_132, %266, %c0_133], %269 {strides = array<i32>} : memref<1x64x128xf32, #tpu.memory_space<vmem>>, vector<1x8x128xf32>,
    %c3_i32_134 = arith.constant 3 : i32
    %c8_i32_135 = arith.constant 8 : i32
    %270 = arith.muli %c3_i32_134, %c8_i32_135 : i32
    %271 = tpu.assume_multiple %270, 8 : i32
    %272 = arith.index_cast %271 : i32 to index
    %c0_136 = arith.constant 0 : index
    %273 = vector.load %arg12[%272, %c0_136] : memref<64x128xf32, #tpu.memory_space<vmem>>, vector<8x128xf32>
    %c0_137 = arith.constant 0 : index
    %c0_138 = arith.constant 0 : index
    %274 = vector.load %arg8[%c0_137, %c0_138] : memref<128x128xf32, #tpu.memory_space<vmem>>, vector<128x128xf32>
    %cst_139 = arith.constant dense<0.000000e+00> : vector<8x128xf32>
    %275 = tpu.matmul %265, %274, %cst_139 {dimension_numbers = #tpu.dot_dimension_numbers<[1], [0], [0], [1], [0, 0, 1, 1], [], []>} : vector<8x128xf32>, vector<128x128xf32>, vector<8x128xf32> -> vector<8x128xf32>
    %276 = arith.addf %273, %275 : vector<8x128xf32>
    %277 = arith.negf %276 : vector<8x128xf32>
    %278 = math.exp %277 : vector<8x128xf32>
    %cst_140 = arith.constant 1.000000e+00 : f32
    %279 = vector.broadcast %cst_140 : f32 to vector<8x128xf32>
    %280 = arith.addf %279, %278 : vector<8x128xf32>
    %281 = arith.divf %279, %280 : vector<8x128xf32>
    %c64_i32_141 = arith.constant 64 : i32
    %282 = tpu.dynamic_rotate %276 by %c64_i32_141 dim 1 : vector<8x128xf32>, i32 -> vector<8x128xf32>
    %cst_142 = arith.constant 0.000000e+00 : f32
    %283 = vector.broadcast %cst_142 : f32 to vector<8x128xf32>
    %284 = arith.maximumf %282, %283 : vector<8x128xf32>
    %285 = arith.mulf %284, %199 : vector<8x128xf32>
    %286 = arith.subf %265, %285 : vector<8x128xf32>
    %287 = arith.mulf %281, %286 : vector<8x128xf32>
    %288 = arith.addf %285, %287 : vector<8x128xf32>
    %c0_143 = arith.constant 0 : index
    %289 = arith.index_cast %271 : i32 to index
    %c0_144 = arith.constant 0 : index
    %290 = vector.load %arg9[%c0_143, %289, %c0_144] : memref<1x64x128xf32, #tpu.memory_space<vmem>>, vector<1x8x128xf32>
    %291 = vector.shape_cast %290 : vector<1x8x128xf32> to vector<8x128xf32>
    %292 = vector.shape_cast %288 : vector<8x128xf32> to vector<1x8x128xf32>
    tpu.vector_store %arg9[%c0_143, %289, %c0_144], %292 {strides = array<i32>} : memref<1x64x128xf32, #tpu.memory_space<vmem>>, vector<1x8x128xf32>,
    %c4_i32_145 = arith.constant 4 : i32
    %c8_i32_146 = arith.constant 8 : i32
    %293 = arith.muli %c4_i32_145, %c8_i32_146 : i32
    %294 = tpu.assume_multiple %293, 8 : i32
    %295 = arith.index_cast %294 : i32 to index
    %c0_147 = arith.constant 0 : index
    %296 = vector.load %arg12[%295, %c0_147] : memref<64x128xf32, #tpu.memory_space<vmem>>, vector<8x128xf32>
    %c0_148 = arith.constant 0 : index
    %c0_149 = arith.constant 0 : index
    %297 = vector.load %arg8[%c0_148, %c0_149] : memref<128x128xf32, #tpu.memory_space<vmem>>, vector<128x128xf32>
    %cst_150 = arith.constant dense<0.000000e+00> : vector<8x128xf32>
    %298 = tpu.matmul %288, %297, %cst_150 {dimension_numbers = #tpu.dot_dimension_numbers<[1], [0], [0], [1], [0, 0, 1, 1], [], []>} : vector<8x128xf32>, vector<128x128xf32>, vector<8x128xf32> -> vector<8x128xf32>
    %299 = arith.addf %296, %298 : vector<8x128xf32>
    %300 = arith.negf %299 : vector<8x128xf32>
    %301 = math.exp %300 : vector<8x128xf32>
    %cst_151 = arith.constant 1.000000e+00 : f32
    %302 = vector.broadcast %cst_151 : f32 to vector<8x128xf32>
    %303 = arith.addf %302, %301 : vector<8x128xf32>
    %304 = arith.divf %302, %303 : vector<8x128xf32>
    %c64_i32_152 = arith.constant 64 : i32
    %305 = tpu.dynamic_rotate %299 by %c64_i32_152 dim 1 : vector<8x128xf32>, i32 -> vector<8x128xf32>
    %cst_153 = arith.constant 0.000000e+00 : f32
    %306 = vector.broadcast %cst_153 : f32 to vector<8x128xf32>
    %307 = arith.maximumf %305, %306 : vector<8x128xf32>
    %308 = arith.mulf %307, %199 : vector<8x128xf32>
    %309 = arith.subf %288, %308 : vector<8x128xf32>
    %310 = arith.mulf %304, %309 : vector<8x128xf32>
    %311 = arith.addf %308, %310 : vector<8x128xf32>
    %c0_154 = arith.constant 0 : index
    %312 = arith.index_cast %294 : i32 to index
    %c0_155 = arith.constant 0 : index
    %313 = vector.load %arg9[%c0_154, %312, %c0_155] : memref<1x64x128xf32, #tpu.memory_space<vmem>>, vector<1x8x128xf32>
    %314 = vector.shape_cast %313 : vector<1x8x128xf32> to vector<8x128xf32>
    %315 = vector.shape_cast %311 : vector<8x128xf32> to vector<1x8x128xf32>
    tpu.vector_store %arg9[%c0_154, %312, %c0_155], %315 {strides = array<i32>} : memref<1x64x128xf32, #tpu.memory_space<vmem>>, vector<1x8x128xf32>,
    %c5_i32_156 = arith.constant 5 : i32
    %c8_i32_157 = arith.constant 8 : i32
    %316 = arith.muli %c5_i32_156, %c8_i32_157 : i32
    %317 = tpu.assume_multiple %316, 8 : i32
    %318 = arith.index_cast %317 : i32 to index
    %c0_158 = arith.constant 0 : index
    %319 = vector.load %arg12[%318, %c0_158] : memref<64x128xf32, #tpu.memory_space<vmem>>, vector<8x128xf32>
    %c0_159 = arith.constant 0 : index
    %c0_160 = arith.constant 0 : index
    %320 = vector.load %arg8[%c0_159, %c0_160] : memref<128x128xf32, #tpu.memory_space<vmem>>, vector<128x128xf32>
    %cst_161 = arith.constant dense<0.000000e+00> : vector<8x128xf32>
    %321 = tpu.matmul %311, %320, %cst_161 {dimension_numbers = #tpu.dot_dimension_numbers<[1], [0], [0], [1], [0, 0, 1, 1], [], []>} : vector<8x128xf32>, vector<128x128xf32>, vector<8x128xf32> -> vector<8x128xf32>
    %322 = arith.addf %319, %321 : vector<8x128xf32>
    %323 = arith.negf %322 : vector<8x128xf32>
    %324 = math.exp %323 : vector<8x128xf32>
    %cst_162 = arith.constant 1.000000e+00 : f32
    %325 = vector.broadcast %cst_162 : f32 to vector<8x128xf32>
    %326 = arith.addf %325, %324 : vector<8x128xf32>
    %327 = arith.divf %325, %326 : vector<8x128xf32>
    %c64_i32_163 = arith.constant 64 : i32
    %328 = tpu.dynamic_rotate %322 by %c64_i32_163 dim 1 : vector<8x128xf32>, i32 -> vector<8x128xf32>
    %cst_164 = arith.constant 0.000000e+00 : f32
    %329 = vector.broadcast %cst_164 : f32 to vector<8x128xf32>
    %330 = arith.maximumf %328, %329 : vector<8x128xf32>
    %331 = arith.mulf %330, %199 : vector<8x128xf32>
    %332 = arith.subf %311, %331 : vector<8x128xf32>
    %333 = arith.mulf %327, %332 : vector<8x128xf32>
    %334 = arith.addf %331, %333 : vector<8x128xf32>
    %c0_165 = arith.constant 0 : index
    %335 = arith.index_cast %317 : i32 to index
    %c0_166 = arith.constant 0 : index
    %336 = vector.load %arg9[%c0_165, %335, %c0_166] : memref<1x64x128xf32, #tpu.memory_space<vmem>>, vector<1x8x128xf32>
    %337 = vector.shape_cast %336 : vector<1x8x128xf32> to vector<8x128xf32>
    %338 = vector.shape_cast %334 : vector<8x128xf32> to vector<1x8x128xf32>
    tpu.vector_store %arg9[%c0_165, %335, %c0_166], %338 {strides = array<i32>} : memref<1x64x128xf32, #tpu.memory_space<vmem>>, vector<1x8x128xf32>,
    %c6_i32_167 = arith.constant 6 : i32
    %c8_i32_168 = arith.constant 8 : i32
    %339 = arith.muli %c6_i32_167, %c8_i32_168 : i32
    %340 = tpu.assume_multiple %339, 8 : i32
    %341 = arith.index_cast %340 : i32 to index
    %c0_169 = arith.constant 0 : index
    %342 = vector.load %arg12[%341, %c0_169] : memref<64x128xf32, #tpu.memory_space<vmem>>, vector<8x128xf32>
    %c0_170 = arith.constant 0 : index
    %c0_171 = arith.constant 0 : index
    %343 = vector.load %arg8[%c0_170, %c0_171] : memref<128x128xf32, #tpu.memory_space<vmem>>, vector<128x128xf32>
    %cst_172 = arith.constant dense<0.000000e+00> : vector<8x128xf32>
    %344 = tpu.matmul %334, %343, %cst_172 {dimension_numbers = #tpu.dot_dimension_numbers<[1], [0], [0], [1], [0, 0, 1, 1], [], []>} : vector<8x128xf32>, vector<128x128xf32>, vector<8x128xf32> -> vector<8x128xf32>
    %345 = arith.addf %342, %344 : vector<8x128xf32>
    %346 = arith.negf %345 : vector<8x128xf32>
    %347 = math.exp %346 : vector<8x128xf32>
    %cst_173 = arith.constant 1.000000e+00 : f32
    %348 = vector.broadcast %cst_173 : f32 to vector<8x128xf32>
    %349 = arith.addf %348, %347 : vector<8x128xf32>
    %350 = arith.divf %348, %349 : vector<8x128xf32>
    %c64_i32_174 = arith.constant 64 : i32
    %351 = tpu.dynamic_rotate %345 by %c64_i32_174 dim 1 : vector<8x128xf32>, i32 -> vector<8x128xf32>
    %cst_175 = arith.constant 0.000000e+00 : f32
    %352 = vector.broadcast %cst_175 : f32 to vector<8x128xf32>
    %353 = arith.maximumf %351, %352 : vector<8x128xf32>
    %354 = arith.mulf %353, %199 : vector<8x128xf32>
    %355 = arith.subf %334, %354 : vector<8x128xf32>
    %356 = arith.mulf %350, %355 : vector<8x128xf32>
    %357 = arith.addf %354, %356 : vector<8x128xf32>
    %c0_176 = arith.constant 0 : index
    %358 = arith.index_cast %340 : i32 to index
    %c0_177 = arith.constant 0 : index
    %359 = vector.load %arg9[%c0_176, %358, %c0_177] : memref<1x64x128xf32, #tpu.memory_space<vmem>>, vector<1x8x128xf32>
    %360 = vector.shape_cast %359 : vector<1x8x128xf32> to vector<8x128xf32>
    %361 = vector.shape_cast %357 : vector<8x128xf32> to vector<1x8x128xf32>
    tpu.vector_store %arg9[%c0_176, %358, %c0_177], %361 {strides = array<i32>} : memref<1x64x128xf32, #tpu.memory_space<vmem>>, vector<1x8x128xf32>,
    %c7_i32_178 = arith.constant 7 : i32
    %c8_i32_179 = arith.constant 8 : i32
    %362 = arith.muli %c7_i32_178, %c8_i32_179 : i32
    %363 = tpu.assume_multiple %362, 8 : i32
    %364 = arith.index_cast %363 : i32 to index
    %c0_180 = arith.constant 0 : index
    %365 = vector.load %arg12[%364, %c0_180] : memref<64x128xf32, #tpu.memory_space<vmem>>, vector<8x128xf32>
    %c0_181 = arith.constant 0 : index
    %c0_182 = arith.constant 0 : index
    %366 = vector.load %arg8[%c0_181, %c0_182] : memref<128x128xf32, #tpu.memory_space<vmem>>, vector<128x128xf32>
    %cst_183 = arith.constant dense<0.000000e+00> : vector<8x128xf32>
    %367 = tpu.matmul %357, %366, %cst_183 {dimension_numbers = #tpu.dot_dimension_numbers<[1], [0], [0], [1], [0, 0, 1, 1], [], []>} : vector<8x128xf32>, vector<128x128xf32>, vector<8x128xf32> -> vector<8x128xf32>
    %368 = arith.addf %365, %367 : vector<8x128xf32>
    %369 = arith.negf %368 : vector<8x128xf32>
    %370 = math.exp %369 : vector<8x128xf32>
    %cst_184 = arith.constant 1.000000e+00 : f32
    %371 = vector.broadcast %cst_184 : f32 to vector<8x128xf32>
    %372 = arith.addf %371, %370 : vector<8x128xf32>
    %373 = arith.divf %371, %372 : vector<8x128xf32>
    %c64_i32_185 = arith.constant 64 : i32
    %374 = tpu.dynamic_rotate %368 by %c64_i32_185 dim 1 : vector<8x128xf32>, i32 -> vector<8x128xf32>
    %cst_186 = arith.constant 0.000000e+00 : f32
    %375 = vector.broadcast %cst_186 : f32 to vector<8x128xf32>
    %376 = arith.maximumf %374, %375 : vector<8x128xf32>
    %377 = arith.mulf %376, %199 : vector<8x128xf32>
    %378 = arith.subf %357, %377 : vector<8x128xf32>
    %379 = arith.mulf %373, %378 : vector<8x128xf32>
    %380 = arith.addf %377, %379 : vector<8x128xf32>
    %c0_187 = arith.constant 0 : index
    %381 = arith.index_cast %363 : i32 to index
    %c0_188 = arith.constant 0 : index
    %382 = vector.load %arg9[%c0_187, %381, %c0_188] : memref<1x64x128xf32, #tpu.memory_space<vmem>>, vector<1x8x128xf32>
    %383 = vector.shape_cast %382 : vector<1x8x128xf32> to vector<8x128xf32>
    %384 = vector.shape_cast %380 : vector<8x128xf32> to vector<1x8x128xf32>
    tpu.vector_store %arg9[%c0_187, %381, %c0_188], %384 {strides = array<i32>} : memref<1x64x128xf32, #tpu.memory_space<vmem>>, vector<1x8x128xf32>,
    %c8_i32_189 = arith.constant 8 : i32
    %c0_190 = arith.constant 0 : index
    %c0_191 = arith.constant 0 : index
    %385 = vector.load %arg11[%c0_190, %c0_191] : memref<8x128xf32, #tpu.memory_space<vmem>>, vector<8x128xf32>
    tpu.vector_store %arg11[%c0_190, %c0_191], %380 {strides = array<i32>} : memref<8x128xf32, #tpu.memory_space<vmem>>, vector<8x128xf32>,
    return
  }
  func.func @transform_0(%arg0: i32, %arg1: i32) -> (i32, i32, i32) {
    %c0_i32 = arith.constant 0 : i32
    %c0_i32_0 = arith.constant 0 : i32
    return %arg0, %arg1, %c0_i32 : i32, i32, i32
  }
  func.func @transform_1(%arg0: i32, %arg1: i32) -> (i32, i32) {
    %c0_i32 = arith.constant 0 : i32
    %c0_i32_0 = arith.constant 0 : i32
    %c0_i32_1 = arith.constant 0 : i32
    return %c0_i32, %c0_i32_0 : i32, i32
  }
  func.func @transform_2(%arg0: i32, %arg1: i32) -> (i32, i32) {
    %c0_i32 = arith.constant 0 : i32
    %c0_i32_0 = arith.constant 0 : i32
    %c0_i32_1 = arith.constant 0 : i32
    return %c0_i32, %c0_i32_0 : i32, i32
  }
  func.func @transform_3(%arg0: i32, %arg1: i32) -> (i32, i32) {
    %c0_i32 = arith.constant 0 : i32
    %c0_i32_0 = arith.constant 0 : i32
    %c0_i32_1 = arith.constant 0 : i32
    return %c0_i32, %c0_i32_0 : i32, i32
  }
  func.func @transform_4(%arg0: i32, %arg1: i32) -> (i32, i32) {
    %c0_i32 = arith.constant 0 : i32
    %c0_i32_0 = arith.constant 0 : i32
    %c0_i32_1 = arith.constant 0 : i32
    return %c0_i32, %c0_i32_0 : i32, i32
  }
  func.func @transform_5(%arg0: i32, %arg1: i32) -> (i32, i32) {
    %c0_i32 = arith.constant 0 : i32
    %c0_i32_0 = arith.constant 0 : i32
    %c0_i32_1 = arith.constant 0 : i32
    return %c0_i32, %c0_i32_0 : i32, i32
  }
  func.func @transform_6(%arg0: i32, %arg1: i32) -> (i32, i32) {
    %c0_i32 = arith.constant 0 : i32
    %c0_i32_0 = arith.constant 0 : i32
    %c0_i32_1 = arith.constant 0 : i32
    return %c0_i32, %c0_i32_0 : i32, i32
  }
  func.func @transform_7(%arg0: i32, %arg1: i32) -> (i32, i32, i32) {
    %c0_i32 = arith.constant 0 : i32
    %c0_i32_0 = arith.constant 0 : i32
    return %arg0, %arg1, %c0_i32 : i32, i32, i32
  }
}

</mosaic_0001>

<bundles_post_ra>
// kernel: tpu_custom_call.1
= control target key start
LH: loop header
LB: loop body
LE: loop exit
PB: predicated region body
PF: predicated region fallthrough
CT: control target
= control target key end

     0   :  { %12 = vsyncpa [#allocation7], 0  ;;  %s2029_s0 = inlined_call_operand.vmem [shape: f32[1,64,16], index: 0, kind: input, shape index: {}]   ;;  %s2030_s1 = inlined_call_operand.vmem [shape: f32[16,128], index: 1, kind: input, shape index: {}]   ;;  %s2031_s2 = inlined_call_operand.vmem [shape: f32[1,128], index: 2, kind: input, shape index: {}]   ;;  %s2032_s3 = inlined_call_operand.hbm [shape: f32[128,128], index: 3, kind: input, shape index: {}]   ;;  %s2033_s4 = inlined_call_operand.hbm [shape: f32[128,128], index: 4, kind: input, shape index: {}]   ;;  %s2034_s5 = inlined_call_operand.vmem [shape: f32[1,128], index: 5, kind: input, shape index: {}]   ;;  %s2035_s6 = inlined_call_operand.hbm [shape: f32[128,128], index: 6, kind: input, shape index: {}]   ;;  %s2036_s7 = inlined_call_operand.hbm [shape: f32[1,64,128], index: 7, kind: output, shape index: {}]  }
   0x1   :  { %13 = vsyncpa [#allocation10], 0 }
   0x2   :  { %14 = vsyncpa [#allocation8], 0  ;;  %s38_s26 = sshll.u32 %s2033_s4, 4  ;;  %s1534_s27 = smov [#allocation9]   ;;  %s39_s26 = int_to_ptr.hbm [resolvable:$true] %s38_s26 }
   0x3   :  { %s40_s28 = sshll.u32 %s1534_s27, 4  ;;  %s25_s8 = sshll.u32 %s2032_s3, 4  ;;  %s41_s28 = int_to_ptr.vmem [resolvable:$true] %s40_s28  ;;  %s26_s8 = int_to_ptr.hbm [resolvable:$true] %s25_s8 }
   0x4   :  { %s1535_s9 = smov 128   ;;  %s1536_s10 = smov 8  }
   0x5   :  { %46 = dma.hbm_to_vmem [thread:$0]  %s39_s26, 2048, %s41_s28, [#allocation10], %s1535_s9, %s1535_s9, %s1536_s10  }
   0x6   :  { %s1537_s11 = smov [#allocation6]   ;;  %s53_s4 = sshll.u32 %s2035_s6, 4  ;;  %s54_s4 = int_to_ptr.hbm [resolvable:$true] %s53_s4 }
   0x7   :  { %s27_s12 = sshll.u32 %s1537_s11, 4  ;;  %s1538_s3 = smov [#allocation11]   ;;  %s28_s12 = int_to_ptr.vmem [resolvable:$true] %s27_s12 }
   0x8   :  { %33 = dma.hbm_to_vmem [thread:$0]  %s26_s8, 2048, %s28_s12, [#allocation7], %s1535_s9, %s1535_s9, %s1536_s10  }
   0x9   :  { %s55_s15 = sshll.u32 %s1538_s3, 4  ;;  %s56_s15 = int_to_ptr.vmem [resolvable:$true] %s55_s15 }
   0xa   :  { %61 = dma.hbm_to_vmem [thread:$0]  %s54_s4, 2048, %s56_s15, [#allocation10], %s1535_s9, %s1535_s9, %s1536_s10  }
   0xb   :  { %1528 = dma.done.wait [#allocation7], 2048  }
   0xc   :  { %1529 = vsyncadd [#allocation7], 4294965248 }
   0xd   :  { %1530 = dma.done.wait [#allocation10], 4096  }
   0xe   :  { %1531 = vsyncadd [#allocation10], 4294963200  ;;  %v1600_v0 = vld [vmem:[#allocation6 + $0x78] sm:$0xff]  ;;  %v1602_v1 = vld [vmem:[#allocation6 + $0x70] sm:$0xff]  ;;  %vm94_vm0 = vcmask 130048   ;;  %v1539_v19 = vmov 0.0   ;;  %v168_v31 = vlaneseq }
   0xf   :  { %190 = vmatpush.msra.mxu1 %v1600_v0  ;;  %256 = vmatpush.msra.mxu2 %v1600_v0  ;;  %v1606_v2 = vld [vmem:[#allocation6 + $0x68] sm:$0xff]  ;;  %v1611_v3 = vld [vmem:[#allocation6 + $0x60] sm:$0xff]  ;;  %v1624_v7 = vld [vmem:[#allocation6 + $0x58] sm:$0xff]  ;;  %s1540_s22 = smov 64   ;;  %s1320_s16 = sshll.u32 %s2036_s7, 4  ;;  %s1321_s16 = int_to_ptr.hbm [resolvable:$true] %s1320_s16 }
  0x10   :  { %323 = vmatpush.msra.mxu3 %v1600_v0  ;;  %v89_v4 = vld [vmem:[%s2030_s1 + $0x8] sm:$0xff]  ;;  %v88_v5 = vld [vmem:[%s2030_s1] sm:$0xff]  ;;  %v1629_v8 = vld [vmem:[#allocation6 + $0x50] sm:$0xff]  ;;  %v169_v33 = vand.u32 127, %v168_v31 }
  0x11   :  { %191 = vmatpush.msra.mxu1 %v1602_v1  ;;  %257 = vmatpush.msra.mxu2 %v1602_v1  ;;  %v80_v6 = vld [vmem:[%s2029_s0] sm:$0xff]  ;;  %v1635_v9 = vld [vmem:[#allocation6 + $0x48] sm:$0xff]  ;;  %v1647_v11 = vld [vmem:[#allocation6 + $0x38] sm:$0xff] }
  0x12   :  { %324 = vmatpush.msra.mxu3 %v1602_v1  ;;  %133 = vmatpush.msra.mxu0 %v89_v4  ;;  %v1641_v10 = vld [vmem:[#allocation6 + $0x40] sm:$0xff]  ;;  %v1653_v12 = vld [vmem:[#allocation6 + $0x30] sm:$0xff]  ;;  %v1659_v13 = vld [vmem:[#allocation6 + $0x28] sm:$0xff]  ;;  %vm170_vm1 = vcmp.lt.s32.totalorder %v169_v33, 32 }
  0x13   :  { %192 = vmatpush.msra.mxu1 %v1606_v2  ;;  %258 = vmatpush.msra.mxu2 %v1606_v2  ;;  %v1665_v14 = vld [vmem:[#allocation6 + $0x20] sm:$0xff]  ;;  %v1671_v15 = vld [vmem:[#allocation6 + $0x18] sm:$0xff]  ;;  %v1677_v16 = vld [vmem:[#allocation6 + $0x10] sm:$0xff]  ;;  %v1767_v36 = vsel %vm170_vm1, 1.0, %v1539_v19 }
  0x14   :  { %325 = vmatpush.msra.mxu3 %v1606_v2  ;;  %134 = vmatpush.msra.mxu0 %v88_v5  ;;  %v1683_v17 = vld [vmem:[#allocation6 + $0x8] sm:$0xff]  ;;  %v1689_v18 = vld [vmem:[#allocation6] sm:$0xff]  ;;  %v82_v55 = vld [vmem:[%s2029_s0 + $0x10] sm:$0xff] }
  0x15   :  { %193 = vmatpush.msra.mxu1 %v1611_v3  ;;  %1334 = vmatmul.msk.f32.vlgmr.msra.gmra.mxu0 %vm94_vm0, %v80_v6  ;;  %v1758_v20 = vld [vmem:[%s2031_s2] ss:$0 sm:$0xff]  ;;  %v81_v28 = vld [vmem:[%s2029_s0 + $0x8] sm:$0xff] }
  0x16   :  { %259 = vmatpush.msra.mxu2 %v1611_v3  ;;  %326 = vmatpush.msra.mxu3 %v1611_v3 }
  0x17   :  { %194 = vmatpush.msra.mxu1 %v1624_v7  ;;  %591 = vmatpush.msrb.mxu0 %v1600_v0 }
  0x18   :  { %260 = vmatpush.msra.mxu2 %v1624_v7  ;;  %327 = vmatpush.msra.mxu3 %v1624_v7 }
  0x19   :  { %195 = vmatpush.msra.mxu1 %v1629_v8  ;;  %592 = vmatpush.msrb.mxu0 %v1602_v1 }
  0x1a   :  { %261 = vmatpush.msra.mxu2 %v1629_v8  ;;  %328 = vmatpush.msra.mxu3 %v1629_v8 }
  0x1b   :  { %196 = vmatpush.msra.mxu1 %v1635_v9  ;;  %593 = vmatpush.msrb.mxu0 %v1606_v2 }
  0x1c   :  { %262 = vmatpush.msra.mxu2 %v1635_v9  ;;  %329 = vmatpush.msra.mxu3 %v1635_v9 }
  0x1d   :  { %197 = vmatpush.msra.mxu1 %v1641_v10  ;;  %594 = vmatpush.msrb.mxu0 %v1611_v3 }
  0x1e   :  { %263 = vmatpush.msra.mxu2 %v1641_v10  ;;  %330 = vmatpush.msra.mxu3 %v1641_v10 }
  0x1f   :  { %198 = vmatpush.msra.mxu1 %v1647_v11  ;;  %595 = vmatpush.msrb.mxu0 %v1624_v7 }
  0x20   :  { %264 = vmatpush.msra.mxu2 %v1647_v11  ;;  %331 = vmatpush.msra.mxu3 %v1647_v11 }
  0x21   :  { %199 = vmatpush.msra.mxu1 %v1653_v12  ;;  %596 = vmatpush.msrb.mxu0 %v1629_v8 }
  0x22   :  { %265 = vmatpush.msra.mxu2 %v1653_v12  ;;  %332 = vmatpush.msra.mxu3 %v1653_v12 }
  0x23   :  { %200 = vmatpush.msra.mxu1 %v1659_v13  ;;  %597 = vmatpush.msrb.mxu0 %v1635_v9 }
  0x24   :  { %266 = vmatpush.msra.mxu2 %v1659_v13  ;;  %333 = vmatpush.msra.mxu3 %v1659_v13 }
  0x25   :  { %201 = vmatpush.msra.mxu1 %v1665_v14  ;;  %598 = vmatpush.msrb.mxu0 %v1641_v10 }
  0x26   :  { %267 = vmatpush.msra.mxu2 %v1665_v14  ;;  %334 = vmatpush.msra.mxu3 %v1665_v14 }
  0x27   :  { %202 = vmatpush.msra.mxu1 %v1671_v15  ;;  %599 = vmatpush.msrb.mxu0 %v1647_v11 }
  0x28   :  { %268 = vmatpush.msra.mxu2 %v1671_v15  ;;  %335 = vmatpush.msra.mxu3 %v1671_v15 }
  0x29   :  { %203 = vmatpush.msra.mxu1 %v1677_v16  ;;  %600 = vmatpush.msrb.mxu0 %v1653_v12 }
  0x2a   :  { %269 = vmatpush.msra.mxu2 %v1677_v16  ;;  %336 = vmatpush.msra.mxu3 %v1677_v16 }
  0x2b   :  { %204 = vmatpush.msra.mxu1 %v1683_v17  ;;  %601 = vmatpush.msrb.mxu0 %v1659_v13 }
  0x2c   :  { %270 = vmatpush.msra.mxu2 %v1683_v17  ;;  %337 = vmatpush.msra.mxu3 %v1683_v17 }
  0x2d   :  { %205 = vmatpush.msra.mxu1 %v1689_v18  ;;  %602 = vmatpush.msrb.mxu0 %v1665_v14 }
  0x2e   :  { %206 = vmatmul.f32.vlgmr.msra.gmra.mxu1 %v1539_v19  ;;  %271 = vmatpush.msra.mxu2 %v1689_v18 }
  0x2f   :  { %338 = vmatpush.msra.mxu3 %v1689_v18  ;;  %390 = vmatpush.msrb.mxu1 %v1600_v0 }
  0x30   :  { %457 = vmatpush.msrb.mxu2 %v1600_v0  ;;  %603 = vmatpush.msrb.mxu0 %v1671_v15 }
  0x31   :  { %524 = vmatpush.msrb.mxu3 %v1600_v0  ;;  %391 = vmatpush.msrb.mxu1 %v1602_v1 }
  0x32   :  { %458 = vmatpush.msrb.mxu2 %v1602_v1  ;;  %604 = vmatpush.msrb.mxu0 %v1677_v16 }
  0x33   :  { %525 = vmatpush.msrb.mxu3 %v1602_v1  ;;  %392 = vmatpush.msrb.mxu1 %v1606_v2 }
  0x34   :  { %459 = vmatpush.msrb.mxu2 %v1606_v2  ;;  %605 = vmatpush.msrb.mxu0 %v1683_v17 }
  0x35   :  { %526 = vmatpush.msrb.mxu3 %v1606_v2  ;;  %393 = vmatpush.msrb.mxu1 %v1611_v3 }
  0x36   :  { %460 = vmatpush.msrb.mxu2 %v1611_v3  ;;  %606 = vmatpush.msrb.mxu0 %v1689_v18 }
  0x37   :  { %527 = vmatpush.msrb.mxu3 %v1611_v3  ;;  %394 = vmatpush.msrb.mxu1 %v1624_v7 }
  0x38   :  { %461 = vmatpush.msrb.mxu2 %v1624_v7  ;;  %1335 = vmatmul.msk.f32.gmra.mxu0 %vm94_vm0, %v81_v28 }
  0x39   :  { %528 = vmatpush.msrb.mxu3 %v1624_v7  ;;  %395 = vmatpush.msrb.mxu1 %v1629_v8 }
  0x3a   :  { %462 = vmatpush.msrb.mxu2 %v1629_v8 }
  0x3b   :  { %529 = vmatpush.msrb.mxu3 %v1629_v8  ;;  %396 = vmatpush.msrb.mxu1 %v1635_v9 }
  0x3c   :  { %463 = vmatpush.msrb.mxu2 %v1635_v9 }
  0x3d   :  { %530 = vmatpush.msrb.mxu3 %v1635_v9  ;;  %397 = vmatpush.msrb.mxu1 %v1641_v10 }
  0x3e   :  { %464 = vmatpush.msrb.mxu2 %v1641_v10 }
  0x3f   :  { %531 = vmatpush.msrb.mxu3 %v1641_v10  ;;  %398 = vmatpush.msrb.mxu1 %v1647_v11 }
  0x40   :  { %465 = vmatpush.msrb.mxu2 %v1647_v11  ;;  %1336 = vmatmul.msk.f32.gmra.mxu0 %vm94_vm0, %v82_v55  ;;  %v719_v55 = vld [vmem:[#allocation9 + $0x18] sm:$0xff] }
  0x41   :  { %532 = vmatpush.msrb.mxu3 %v1647_v11  ;;  %399 = vmatpush.msrb.mxu1 %v1653_v12 }
  0x42   :  { %466 = vmatpush.msrb.mxu2 %v1653_v12 }
  0x43   :  { %533 = vmatpush.msrb.mxu3 %v1653_v12  ;;  %400 = vmatpush.msrb.mxu1 %v1659_v13 }
  0x44   :  { %467 = vmatpush.msrb.mxu2 %v1659_v13 }
  0x45   :  { %534 = vmatpush.msrb.mxu3 %v1659_v13  ;;  %401 = vmatpush.msrb.mxu1 %v1665_v14 }
  0x46   :  { %468 = vmatpush.msrb.mxu2 %v1665_v14 }
  0x47   :  { %535 = vmatpush.msrb.mxu3 %v1665_v14  ;;  %402 = vmatpush.msrb.mxu1 %v1671_v15  ;;  %v83_v14 = vld [vmem:[%s2029_s0 + $0x18] sm:$0xff] }
  0x48   :  { %469 = vmatpush.msrb.mxu2 %v1671_v15  ;;  %1337 = vmatmul.msk.f32.gmra.mxu0 %vm94_vm0, %v83_v14 }
  0x49   :  { %536 = vmatpush.msrb.mxu3 %v1671_v15  ;;  %403 = vmatpush.msrb.mxu1 %v1677_v16 }
  0x4a   :  { %470 = vmatpush.msrb.mxu2 %v1677_v16 }
  0x4b   :  { %537 = vmatpush.msrb.mxu3 %v1677_v16  ;;  %404 = vmatpush.msrb.mxu1 %v1683_v17 }
  0x4c   :  { %471 = vmatpush.msrb.mxu2 %v1683_v17 }
  0x4d   :  { %538 = vmatpush.msrb.mxu3 %v1683_v17  ;;  %405 = vmatpush.msrb.mxu1 %v1689_v18 }
  0x4e   :  { %472 = vmatpush.msrb.mxu2 %v1689_v18 }
  0x4f   :  { %539 = vmatpush.msrb.mxu3 %v1689_v18 }
  0x92   :  { %v136_v21 = vpop.f32.mrf.mxu0 }
  0x93   :  { %v137_v22 = vadd.f32 %v1758_v20, %v136_v21 }
  0xab   :  { %v207_v23 = vpop.f32.mrf.mxu1 }
  0xac   :  { %v210_v24 = vadd.f32 %v207_v23, %v137_v22 }
  0xae   :  { %230 = vrot.lane.b32.xlu0 %v210_v24, %s1540_s22  ;;  %v1342_v25 = vmul.f32 -1.442695, %v210_v24 }
  0xb0   :  { %1368 = vpow2.f32 %v1342_v25 }
  0xb5   :  { %v139_v48 = vpop.f32.mrf.mxu0 }
  0xb6   :  { %v1369_v26 = vpop.eup %1368  ;;  %v140_v49 = vadd.f32 %v1758_v20, %v139_v48  ;;  %v724_v48 = vld [vmem:[#allocation9 + $0x40] sm:$0xff] }
  0xb7   :  { %v214_v27 = vadd.f32 1.0, %v1369_v26 }
  0xb9   :  { %1370 = vrcp.f32 %v214_v27  ;;  %v226_v38 = vand.u32 2147483648, %v214_v27  ;;  %vm220_vm3 = vweird.f32 %v214_v27  ;;  %v224_v40 = vand.u32 2147483647, %v214_v27 }
  0xbb   :  { %v227_v43 = vor.u32 1.1754944e-38, %v226_v38  ;;  %vm225_vm5 = vcmp.eq.f32.partialorder %v224_v40, 8.507059e+37  ;;  %v728_v38 = vld [vmem:[#allocation9 + $0x60] sm:$0xff]  ;;  %v727_v40 = vld [vmem:[#allocation9 + $0x58] sm:$0xff] }
  0xbd   :  { %v142_v8 = vpop.f32.mrf.mxu0 }
  0xbe   :  { %v143_v9 = vadd.f32 %v1758_v20, %v142_v8 }
  0xbf   :  { %v1371_v29 = vpop.eup %1370 }
  0xc0   :  { %v216_v30 = vmul.f32 %v1371_v29, %v214_v27  ;;  %vm221_vm2 = vweird.f32 %v1371_v29 }
  0xc1   :  { %vm222_vm4 = vmor %vm220_vm3, %vm221_vm2 }
  0xc2   :  { %v217_v32 = vsub.f32 1.0, %v216_v30 }
  0xc4   :  { %v218_v34 = vmul.f32 %v1371_v29, %v217_v32 }
  0xc6   :  { %v219_v35 = vadd.f32 %v1371_v29, %v218_v34  ;;  %v731_v34 = vld [vmem:[#allocation9 + $0x78] sm:$0xff] }
  0xc8   :  { %v223_v42 = vsel %vm222_vm4, %v1371_v29, %v219_v35  ;;  %v730_v35 = vld [vmem:[#allocation9 + $0x70] sm:$0xff] }
  0xc9   :  { %v228_v45 = vsel %vm225_vm5, %v227_v43, %v223_v42  ;;  %v726_v42 = vld [vmem:[#allocation9 + $0x50] sm:$0xff]  ;;  %v725_v43 = vld [vmem:[#allocation9 + $0x48] sm:$0xff] }
 0x120   :  { %v231_v37 = vpop.permute.xlu0 %230 }
 0x121   :  { %v232_v39 = vmax.f32 %v231_v37, 0.0  ;;  %v729_v37 = vld [vmem:[#allocation9 + $0x68] sm:$0xff] }
 0x123   :  { %v233_v41 = vmul.f32 %v232_v39, %v1767_v36  ;;  %v145_v39 = vpop.f32.mrf.mxu0 }
 0x125   :  { %v234_v44 = vsub.f32 0.0, %v233_v41 }
 0x127   :  { %v235_v46 = vmul.f32 %v234_v44, %v228_v45 }
 0x129   :  { %v1770_v47 = vadd.f32 %v235_v46, %v233_v41  ;;  %v146_v41 = vadd.f32 %v1758_v20, %v145_v39 }
 0x12b   :  { %272 = vmatmul.f32.vlgmr.msra.gmra.mxu2 %v1770_v47 }
 0x12c   :  { %736 = vmatpush.msra.mxu2 %v731_v34  ;;  %v85_v34 = vld [vmem:[%s2029_s0 + $0x28] sm:$0xff] }
 0x12e   :  { %737 = vmatpush.msra.mxu2 %v730_v35  ;;  %v1869_v35 = vld [vmem:[#allocation11 + $0x8] sm:$0xff] }
 0x130   :  { %738 = vmatpush.msra.mxu2 %v729_v37  ;;  %v1873_v37 = vld [vmem:[#allocation11] sm:$0xff] }
 0x132   :  { %739 = vmatpush.msra.mxu2 %v728_v38 }
 0x134   :  { %740 = vmatpush.msra.mxu2 %v727_v40 }
 0x136   :  { %741 = vmatpush.msra.mxu2 %v726_v42 }
 0x138   :  { %742 = vmatpush.msra.mxu2 %v725_v43 }
 0x13a   :  { %743 = vmatpush.msra.mxu2 %v724_v48 }
 0x1ae   :  { %v273_v50 = vpop.f32.mrf.mxu2 }
 0x1af   :  { %v276_v51 = vadd.f32 %v273_v50, %v140_v49  ;;  %v723_v50 = vld [vmem:[#allocation9 + $0x38] sm:$0xff] }
 0x1b0   :  { %744 = vmatpush.msra.mxu2 %v723_v50 }
 0x1b1   :  { %296 = vrot.lane.b32.xlu0 %v276_v51, %s1540_s22  ;;  %v1343_v52 = vmul.f32 -1.442695, %v276_v51  ;;  %v722_v51 = vld [vmem:[#allocation9 + $0x30] sm:$0xff] }
 0x1b2   :  { %745 = vmatpush.msra.mxu2 %v722_v51 }
 0x1b3   :  { %1372 = vpow2.f32 %v1343_v52  ;;  %v721_v52 = vld [vmem:[#allocation9 + $0x28] sm:$0xff] }
 0x1b4   :  { %746 = vmatpush.msra.mxu2 %v721_v52 }
 0x1b9   :  { %v1373_v53 = vpop.eup %1372 }
 0x1ba   :  { %v280_v54 = vadd.f32 1.0, %v1373_v53 }
 0x1bc   :  { %1374 = vrcp.f32 %v280_v54  ;;  %v292_v62 = vand.u32 2147483648, %v280_v54  ;;  %vm286_vm7 = vweird.f32 %v280_v54  ;;  %v290_v0 = vand.u32 2147483647, %v280_v54 }
 0x1be   :  { %v293_v3 = vor.u32 1.1754944e-38, %v292_v62  ;;  %vm291_vm9 = vcmp.eq.f32.partialorder %v290_v0, 8.507059e+37 }
 0x1c2   :  { %v1375_v56 = vpop.eup %1374 }
 0x1c3   :  { %v282_v57 = vmul.f32 %v1375_v56, %v280_v54  ;;  %vm287_vm6 = vweird.f32 %v1375_v56  ;;  %v720_v54 = vld [vmem:[#allocation9 + $0x20] sm:$0xff] }
 0x1c4   :  { %vm288_vm8 = vmor %vm286_vm7, %vm287_vm6  ;;  %747 = vmatpush.msra.mxu2 %v720_v54 }
 0x1c5   :  { %v283_v58 = vsub.f32 1.0, %v282_v57  ;;  %v84_v57 = vld [vmem:[%s2029_s0 + $0x20] sm:$0xff] }
 0x1c6   :  { %748 = vmatpush.msra.mxu2 %v719_v55  ;;  %1338 = vmatmul.msk.f32.gmra.mxu0 %vm94_vm0, %v84_v57 }
 0x1c7   :  { %v284_v59 = vmul.f32 %v1375_v56, %v283_v58  ;;  %v717_v58 = vld [vmem:[#allocation9 + $0x8] sm:$0xff] }
 0x1c9   :  { %v285_v60 = vadd.f32 %v1375_v56, %v284_v59  ;;  %v716_v59 = vld [vmem:[#allocation9] sm:$0xff] }
 0x1cb   :  { %v289_v2 = vsel %vm288_vm8, %v1375_v56, %v285_v60  ;;  %v718_v56 = vld [vmem:[#allocation9 + $0x10] sm:$0xff] }
 0x1cc   :  { %v294_v5 = vsel %vm291_vm9, %v293_v3, %v289_v2  ;;  %749 = vmatpush.msra.mxu2 %v718_v56  ;;  %v86_v56 = vld [vmem:[%s2029_s0 + $0x30] sm:$0xff] }
 0x1ce   :  { %750 = vmatpush.msra.mxu2 %v717_v58  ;;  %1339 = vmatmul.msk.f32.gmra.mxu0 %vm94_vm0, %v85_v34 }
 0x1d0   :  { %751 = vmatpush.msra.mxu2 %v716_v59  ;;  %v1911_v59 = vld [vmem:[%s2034_s5] ss:$0 sm:$0xff] }
 0x1d6   :  { %1340 = vmatmul.msk.f32.gmra.mxu0 %vm94_vm0, %v86_v56 }
 0x223   :  { %v297_v61 = vpop.permute.xlu0 %296 }
 0x224   :  { %v298_v63 = vmax.f32 %v297_v61, 0.0 }
 0x226   :  { %v299_v1 = vmul.f32 %v298_v63, %v1767_v36 }
 0x228   :  { %v300_v4 = vsub.f32 %v1770_v47, %v299_v1 }
 0x22a   :  { %v301_v6 = vmul.f32 %v300_v4, %v294_v5 }
 0x22c   :  { %v1781_v7 = vadd.f32 %v301_v6, %v299_v1 }
 0x22e   :  { %339 = vmatmul.f32.vlgmr.msra.gmra.mxu3 %v1781_v7 }
 0x2b1   :  { %v340_v10 = vpop.f32.mrf.mxu3 }
 0x2b2   :  { %v343_v11 = vadd.f32 %v340_v10, %v143_v9 }
 0x2b4   :  { %363 = vrot.lane.b32.xlu1 %v343_v11, %s1540_s22  ;;  %v1344_v12 = vmul.f32 -1.442695, %v343_v11 }
 0x2b6   :  { %1376 = vpow2.f32 %v1344_v12 }
 0x2bc   :  { %v1377_v13 = vpop.eup %1376 }
 0x2bd   :  { %v347_v15 = vadd.f32 1.0, %v1377_v13  ;;  %v148_v13 = vpop.f32.mrf.mxu0 }
 0x2be   :  { %v149_v14 = vadd.f32 %v1758_v20, %v148_v13 }
 0x2bf   :  { %1378 = vrcp.f32 %v347_v15  ;;  %v359_v24 = vand.u32 2147483648, %v347_v15  ;;  %vm353_vm11 = vweird.f32 %v347_v15  ;;  %v357_v26 = vand.u32 2147483647, %v347_v15 }
 0x2c1   :  { %v360_v29 = vor.u32 1.1754944e-38, %v359_v24  ;;  %vm358_vm13 = vcmp.eq.f32.partialorder %v357_v26, 8.507059e+37 }
 0x2c5   :  { %v1379_v16 = vpop.eup %1378 }
 0x2c6   :  { %v349_v17 = vmul.f32 %v1379_v16, %v347_v15  ;;  %vm354_vm10 = vweird.f32 %v1379_v16 }
 0x2c7   :  { %vm355_vm12 = vmor %vm353_vm11, %vm354_vm10 }
 0x2c8   :  { %v350_v18 = vsub.f32 1.0, %v349_v17  ;;  %v1811_v17 = vld [vmem:[#allocation11 + $0x78] sm:$0xff] }
 0x2c9   :  { %803 = vmatpush.msra.mxu3 %v1811_v17  ;;  %868 = vmatpush.msra.mxu0 %v1811_v17 }
 0x2ca   :  { %v351_v21 = vmul.f32 %v1379_v16, %v350_v18  ;;  %v1813_v18 = vld [vmem:[#allocation11 + $0x70] sm:$0xff] }
 0x2cb   :  { %804 = vmatpush.msra.mxu3 %v1813_v18  ;;  %869 = vmatpush.msra.mxu0 %v1813_v18 }
 0x2cc   :  { %v352_v22 = vadd.f32 %v1379_v16, %v351_v21  ;;  %v1826_v21 = vld [vmem:[#allocation11 + $0x58] sm:$0xff] }
 0x2ce   :  { %v356_v28 = vsel %vm355_vm12, %v1379_v16, %v352_v22  ;;  %v1830_v22 = vld [vmem:[#allocation11 + $0x50] sm:$0xff] }
 0x2cf   :  { %v361_v31 = vsel %vm358_vm13, %v360_v29, %v356_v28  ;;  %v1848_v28 = vld [vmem:[#allocation11 + $0x30] sm:$0xff]  ;;  %v1850_v29 = vld [vmem:[#allocation11 + $0x28] sm:$0xff] }
 0x326   :  { %v364_v23 = vpop.permute.xlu1 %363 }
 0x327   :  { %v365_v25 = vmax.f32 %v364_v23, 0.0  ;;  %v1834_v23 = vld [vmem:[#allocation11 + $0x48] sm:$0xff] }
 0x329   :  { %v366_v27 = vmul.f32 %v365_v25, %v1767_v36  ;;  %v1840_v25 = vld [vmem:[#allocation11 + $0x40] sm:$0xff] }
 0x32b   :  { %v367_v30 = vsub.f32 %v1781_v7, %v366_v27 }
 0x32d   :  { %v368_v32 = vmul.f32 %v367_v30, %v361_v31  ;;  %v1854_v31 = vld [vmem:[#allocation11 + $0x20] sm:$0xff] }
 0x32f   :  { %v1792_v33 = vadd.f32 %v368_v32, %v366_v27  ;;  %v1844_v27 = vld [vmem:[#allocation11 + $0x38] sm:$0xff] }
 0x330   :  { %v1860_v32 = vld [vmem:[#allocation11 + $0x18] sm:$0xff] }
 0x331   :  { %406 = vmatmul.f32.vlgmr.msrb.gmra.mxu1 %v1792_v33 }
 0x3ae   :  { %v407_v44 = vpop.f32.mrf.mxu1 }
 0x3af   :  { %v410_v45 = vadd.f32 %v407_v44, %v146_v41 }
 0x3b1   :  { %430 = vrot.lane.b32.xlu1 %v410_v45, %s1540_s22  ;;  %v1345_v46 = vmul.f32 -1.442695, %v410_v45 }
 0x3b3   :  { %1380 = vpow2.f32 %v1345_v46 }
 0x3b9   :  { %v1381_v49 = vpop.eup %1380 }
 0x3ba   :  { %v414_v53 = vadd.f32 1.0, %v1381_v49 }
 0x3bc   :  { %1382 = vrcp.f32 %v414_v53  ;;  %v426_v2 = vand.u32 2147483648, %v414_v53  ;;  %vm420_vm15 = vweird.f32 %v414_v53  ;;  %v424_v4 = vand.u32 2147483647, %v414_v53 }
 0x3be   :  { %v427_v8 = vor.u32 1.1754944e-38, %v426_v2  ;;  %vm425_vm2 = vcmp.eq.f32.partialorder %v424_v4, 8.507059e+37 }
 0x3c2   :  { %v1383_v60 = vpop.eup %1382 }
 0x3c3   :  { %v416_v61 = vmul.f32 %v1383_v60, %v414_v53  ;;  %vm421_vm14 = vweird.f32 %v1383_v60 }
 0x3c4   :  { %vm422_vm1 = vmor %vm420_vm15, %vm421_vm14 }
 0x3c5   :  { %v417_v62 = vsub.f32 1.0, %v416_v61 }
 0x3c7   :  { %v418_v63 = vmul.f32 %v1383_v60, %v417_v62 }
 0x3c9   :  { %v419_v0 = vadd.f32 %v1383_v60, %v418_v63 }
 0x3cb   :  { %v423_v6 = vsel %vm422_vm1, %v1383_v60, %v419_v0 }
 0x3cc   :  { %v428_v10 = vsel %vm425_vm2, %v427_v8, %v423_v6 }
 0x423   :  { %v431_v1 = vpop.permute.xlu1 %430 }
 0x424   :  { %v432_v3 = vmax.f32 %v431_v1, 0.0  ;;  %v87_v1 = vld [vmem:[%s2029_s0 + $0x38] sm:$0xff]  ;;  %s1541_s0 = smov [#allocation12]  }
 0x425   :  { %1341 = vmatmul.msk.f32.gmra.mxu0 %vm94_vm0, %v87_v1  ;;  %v655_v1 = vld [vmem:[#allocation6 + $0x68] sm:$0xff]  ;;  %s1318_s5 = sshll.u32 %s1541_s0, 4  ;;  %s1319_s5 = int_to_ptr.vmem [resolvable:$true] %s1318_s5 }
 0x426   :  { %v433_v5 = vmul.f32 %v432_v3, %v1767_v36 }
 0x428   :  { %v434_v9 = vsub.f32 %v1792_v33, %v433_v5 }
 0x42a   :  { %v435_v11 = vmul.f32 %v434_v9, %v428_v10 }
 0x42c   :  { %v1803_v12 = vadd.f32 %v435_v11, %v433_v5 }
 0x42e   :  { %473 = vmatmul.f32.vlgmr.msrb.gmra.mxu2 %v1803_v12 }
 0x436   :  { %752 = vmatmul.f32.vlgmr.msra.gmra.mxu2 %v1770_v47  ;;  %v1818_v47 = vld [vmem:[#allocation11 + $0x68] sm:$0xff] }
 0x437   :  { %805 = vmatpush.msra.mxu3 %v1818_v47  ;;  %870 = vmatpush.msra.mxu0 %v1818_v47 }
 0x43e   :  { %755 = vmatmul.f32.gmra.mxu2 %v1781_v7  ;;  %v1822_v7 = vld [vmem:[#allocation11 + $0x60] sm:$0xff] }
 0x43f   :  { %806 = vmatpush.msra.mxu3 %v1822_v7  ;;  %871 = vmatpush.msra.mxu0 %v1822_v7 }
 0x441   :  { %807 = vmatpush.msra.mxu3 %v1826_v21  ;;  %872 = vmatpush.msra.mxu0 %v1826_v21 }
 0x443   :  { %808 = vmatpush.msra.mxu3 %v1830_v22  ;;  %873 = vmatpush.msra.mxu0 %v1830_v22 }
 0x445   :  { %809 = vmatpush.msra.mxu3 %v1834_v23  ;;  %874 = vmatpush.msra.mxu0 %v1834_v23 }
 0x446   :  { %758 = vmatmul.f32.gmra.mxu2 %v1792_v33  ;;  %v1862_v33 = vld [vmem:[#allocation11 + $0x10] sm:$0xff] }
 0x447   :  { %810 = vmatpush.msra.mxu3 %v1840_v25  ;;  %875 = vmatpush.msra.mxu0 %v1840_v25 }
 0x449   :  { %811 = vmatpush.msra.mxu3 %v1844_v27  ;;  %876 = vmatpush.msra.mxu0 %v1844_v27 }
 0x44b   :  { %812 = vmatpush.msra.mxu3 %v1848_v28  ;;  %877 = vmatpush.msra.mxu0 %v1848_v28 }
 0x44d   :  { %813 = vmatpush.msra.mxu3 %v1850_v29  ;;  %878 = vmatpush.msra.mxu0 %v1850_v29 }
 0x44e   :  { %761 = vmatmul.f32.gmra.mxu2 %v1803_v12 }
 0x44f   :  { %814 = vmatpush.msra.mxu3 %v1854_v31  ;;  %879 = vmatpush.msra.mxu0 %v1854_v31 }
 0x451   :  { %815 = vmatpush.msra.mxu3 %v1860_v32  ;;  %880 = vmatpush.msra.mxu0 %v1860_v32 }
 0x453   :  { %816 = vmatpush.msra.mxu3 %v1862_v33  ;;  %881 = vmatpush.msra.mxu0 %v1862_v33 }
 0x455   :  { %817 = vmatpush.msra.mxu3 %v1869_v35  ;;  %882 = vmatpush.msra.mxu0 %v1869_v35 }
 0x457   :  { %818 = vmatpush.msra.mxu3 %v1873_v37  ;;  %883 = vmatpush.msra.mxu0 %v1873_v37 }
 0x4b1   :  { %v474_v15 = vpop.f32.mrf.mxu2 }
 0x4b2   :  { %v477_v16 = vadd.f32 %v474_v15, %v149_v14 }
 0x4b4   :  { %497 = vrot.lane.b32.xlu2 %v477_v16, %s1540_s22  ;;  %v1346_v24 = vmul.f32 -1.442695, %v477_v16 }
 0x4b6   :  { %1384 = vpow2.f32 %v1346_v24 }
 0x4b9   :  { %v753_v60 = vpop.f32.mrf.mxu2 }
 0x4ba   :  { %v754_v61 = vadd.f32 %v1911_v59, %v753_v60 }
 0x4bc   :  { %v1385_v26 = vpop.eup %1384 }
 0x4bd   :  { %v481_v30 = vadd.f32 1.0, %v1385_v26 }
 0x4bf   :  { %1386 = vrcp.f32 %v481_v30  ;;  %v493_v44 = vand.u32 2147483648, %v481_v30  ;;  %vm487_vm4 = vweird.f32 %v481_v30  ;;  %v491_v46 = vand.u32 2147483647, %v481_v30 }
 0x4c1   :  { %v494_v50 = vor.u32 1.1754944e-38, %v493_v44  ;;  %vm492_vm6 = vcmp.eq.f32.partialorder %v491_v46, 8.507059e+37 }
 0x4c5   :  { %v1387_v38 = vpop.eup %1386 }
 0x4c6   :  { %v483_v39 = vmul.f32 %v1387_v38, %v481_v30  ;;  %vm488_vm3 = vweird.f32 %v1387_v38 }
 0x4c7   :  { %vm489_vm5 = vmor %vm487_vm4, %vm488_vm3 }
 0x4c8   :  { %v484_v40 = vsub.f32 1.0, %v483_v39 }
 0x4ca   :  { %v485_v41 = vmul.f32 %v1387_v38, %v484_v40 }
 0x4cc   :  { %v486_v42 = vadd.f32 %v1387_v38, %v485_v41 }
 0x4ce   :  { %v490_v49 = vsel %vm489_vm5, %v1387_v38, %v486_v42 }
 0x4cf   :  { %v495_v52 = vsel %vm492_vm6, %v494_v50, %v490_v49 }
 0x50e   :  { %v498_v43 = vpop.permute.xlu2 %497 }
 0x50f   :  { %v499_v45 = vmax.f32 %v498_v43, 0.0 }
 0x511   :  { %v500_v48 = vmul.f32 %v499_v45, %v1767_v36 }
 0x513   :  { %v501_v51 = vsub.f32 %v1803_v12, %v500_v48 }
 0x515   :  { %v502_v53 = vmul.f32 %v501_v51, %v495_v52 }
 0x517   :  { %v1882_v54 = vadd.f32 %v502_v53, %v500_v48 }
 0x519   :  { %540 = vmatmul.f32.vlgmr.msrb.gmra.mxu3 %v1882_v54  ;;  %764 = vmatmul.f32.gmra.mxu2 %v1882_v54 }
 0x51a   :  { %1000 = vmatpush.msrb.mxu3 %v1811_v17 }
 0x51c   :  { %1001 = vmatpush.msrb.mxu3 %v1813_v18 }
 0x51e   :  { %1002 = vmatpush.msrb.mxu3 %v1818_v47 }
 0x520   :  { %1003 = vmatpush.msrb.mxu3 %v1822_v7 }
 0x521   :  { %819 = vmatmul.f32.vlgmr.msra.gmra.mxu3 %v1539_v19  ;;  %v151_v19 = vpop.f32.mrf.mxu0 }
 0x522   :  { %1004 = vmatpush.msrb.mxu3 %v1826_v21  ;;  %v152_v55 = vadd.f32 %v1758_v20, %v151_v19 }
 0x524   :  { %1005 = vmatpush.msrb.mxu3 %v1830_v22 }
 0x526   :  { %1006 = vmatpush.msrb.mxu3 %v1834_v23 }
 0x528   :  { %1007 = vmatpush.msrb.mxu3 %v1840_v25 }
 0x52a   :  { %1008 = vmatpush.msrb.mxu3 %v1844_v27 }
 0x52c   :  { %1009 = vmatpush.msrb.mxu3 %v1848_v28 }
 0x52e   :  { %1010 = vmatpush.msrb.mxu3 %v1850_v29 }
 0x530   :  { %1011 = vmatpush.msrb.mxu3 %v1854_v31 }
 0x532   :  { %1012 = vmatpush.msrb.mxu3 %v1860_v32 }
 0x534   :  { %1013 = vmatpush.msrb.mxu3 %v1862_v33 }
 0x536   :  { %1014 = vmatpush.msrb.mxu3 %v1869_v35 }
 0x538   :  { %1015 = vmatpush.msrb.mxu3 %v1873_v37 }
 0x59c   :  { %v541_v57 = vpop.f32.mrf.mxu3 }
 0x59d   :  { %v544_v58 = vadd.f32 %v541_v57, %v152_v55  ;;  %v154_v57 = vpop.f32.mrf.mxu0 }
 0x59e   :  { %v155_v60 = vadd.f32 %v1758_v20, %v154_v57 }
 0x59f   :  { %564 = vrot.lane.b32.xlu2 %v544_v58, %s1540_s22  ;;  %v1347_v0 = vmul.f32 -1.442695, %v544_v58 }
 0x5a1   :  { %1388 = vpow2.f32 %v1347_v0  ;;  %v656_v0 = vld [vmem:[#allocation6 + $0x70] sm:$0xff] }
 0x5a4   :  { %v820_v62 = vpop.f32.mrf.mxu3 }
 0x5a5   :  { %v823_v63 = vadd.f32 %v820_v62, %v754_v61  ;;  %v1947_v58 = vpop.f32.mrf.mxu0 }
 0x5a7   :  { %843 = vrot.lane.b32.xlu0 %v823_v63, %s1540_s22  ;;  %v1389_v2 = vpop.eup %1388  ;;  %v1350_v8 = vmul.f32 -1.442695, %v823_v63  ;;  %v657_v63 = vld [vmem:[#allocation6 + $0x78] sm:$0xff] }
 0x5a8   :  { %v548_v3 = vadd.f32 1.0, %v1389_v2  ;;  %658 = vmatpush.msra.mxu1 %v657_v63  ;;  %v654_v2 = vld [vmem:[#allocation6 + $0x60] sm:$0xff] }
 0x5aa   :  { %1390 = vrcp.f32 %v548_v3  ;;  %v560_v12 = vand.u32 2147483648, %v548_v3  ;;  %vm554_vm8 = vweird.f32 %v548_v3  ;;  %v558_v14 = vand.u32 2147483647, %v548_v3  ;;  %659 = vmatpush.msra.mxu1 %v656_v0 }
 0x5ab   :  { %1392 = vpow2.f32 %v1350_v8 }
 0x5ac   :  { %v561_v26 = vor.u32 1.1754944e-38, %v560_v12  ;;  %vm559_vm0 = vcmp.eq.f32.partialorder %v558_v14, 8.507059e+37  ;;  %660 = vmatpush.msra.mxu1 %v655_v1  ;;  %v649_v12 = vld [vmem:[#allocation6 + $0x38] sm:$0xff]  ;;  %v647_v14 = vld [vmem:[#allocation6 + $0x28] sm:$0xff] }
 0x5ae   :  { %661 = vmatpush.msra.mxu1 %v654_v2 }
 0x5b0   :  { %v1391_v4 = vpop.eup %1390 }
 0x5b1   :  { %v550_v5 = vmul.f32 %v1391_v4, %v548_v3  ;;  %vm555_vm7 = vweird.f32 %v1391_v4  ;;  %v1393_v15 = vpop.eup %1392  ;;  %v756_v3 = vpop.f32.mrf.mxu2 }
 0x5b2   :  { %vm556_vm9 = vmor %vm554_vm8, %vm555_vm7  ;;  %v827_v34 = vadd.f32 1.0, %v1393_v15  ;;  %v646_v15 = vld [vmem:[#allocation6 + $0x20] sm:$0xff] }
 0x5b3   :  { %v551_v6 = vsub.f32 1.0, %v550_v5  ;;  %v757_v5 = vadd.f32 %v1911_v59, %v756_v3 }
 0x5b4   :  { %1394 = vrcp.f32 %v827_v34  ;;  %v839_v48 = vand.u32 2147483648, %v827_v34  ;;  %vm833_vm11 = vweird.f32 %v827_v34  ;;  %v837_v49 = vand.u32 2147483647, %v827_v34 }
 0x5b5   :  { %v552_v9 = vmul.f32 %v1391_v4, %v551_v6  ;;  %v652_v6 = vld [vmem:[#allocation6 + $0x50] sm:$0xff] }
 0x5b6   :  { %v840_v53 = vor.u32 1.1754944e-38, %v839_v48  ;;  %vm838_vm13 = vcmp.eq.f32.partialorder %v837_v49, 8.507059e+37 }
 0x5b7   :  { %v553_v10 = vadd.f32 %v1391_v4, %v552_v9 }
 0x5b9   :  { %v557_v24 = vsel %vm556_vm9, %v1391_v4, %v553_v10  ;;  %v653_v4 = vld [vmem:[#allocation6 + $0x58] sm:$0xff]  ;;  %v651_v10 = vld [vmem:[#allocation6 + $0x48] sm:$0xff] }
 0x5ba   :  { %v562_v38 = vsel %vm559_vm0, %v561_v26, %v557_v24  ;;  %v1395_v41 = vpop.eup %1394  ;;  %662 = vmatpush.msra.mxu1 %v653_v4  ;;  %v644_v24 = vld [vmem:[#allocation6 + $0x10] sm:$0xff]  ;;  %v643_v26 = vld [vmem:[#allocation6 + $0x8] sm:$0xff] }
 0x5bb   :  { %v829_v42 = vmul.f32 %v1395_v41, %v827_v34  ;;  %vm834_vm10 = vweird.f32 %v1395_v41 }
 0x5bc   :  { %vm835_vm12 = vmor %vm833_vm11, %vm834_vm10  ;;  %663 = vmatpush.msra.mxu1 %v652_v6 }
 0x5bd   :  { %v830_v43 = vsub.f32 1.0, %v829_v42 }
 0x5be   :  { %664 = vmatpush.msra.mxu1 %v651_v10 }
 0x5bf   :  { %v831_v44 = vmul.f32 %v1395_v41, %v830_v43 }
 0x5c1   :  { %v832_v45 = vadd.f32 %v1395_v41, %v831_v44 }
 0x5c3   :  { %v836_v51 = vsel %vm835_vm12, %v1395_v41, %v832_v45 }
 0x5c4   :  { %v841_v19 = vsel %vm838_vm13, %v840_v53, %v836_v51 }
 0x5f9   :  { %v565_v11 = vpop.permute.xlu2 %564 }
 0x5fa   :  { %v566_v13 = vmax.f32 %v565_v11, 0.0  ;;  %v650_v11 = vld [vmem:[#allocation6 + $0x40] sm:$0xff] }
 0x5fb   :  { %665 = vmatpush.msra.mxu1 %v650_v11 }
 0x5fc   :  { %v567_v16 = vmul.f32 %v566_v13, %v1767_v36  ;;  %v648_v13 = vld [vmem:[#allocation6 + $0x30] sm:$0xff] }
 0x5fd   :  { %666 = vmatpush.msra.mxu1 %v649_v12 }
 0x5fe   :  { %v568_v30 = vsub.f32 %v1882_v54, %v567_v16 }
 0x5ff   :  { %667 = vmatpush.msra.mxu1 %v648_v13 }
 0x600   :  { %v569_v39 = vmul.f32 %v568_v30, %v562_v38  ;;  %v642_v30 = vld [vmem:[#allocation6] sm:$0xff] }
 0x601   :  { %668 = vmatpush.msra.mxu1 %v647_v14 }
 0x602   :  { %v1922_v40 = vadd.f32 %v569_v39, %v567_v16  ;;  %v645_v16 = vld [vmem:[#allocation6 + $0x18] sm:$0xff] }
 0x603   :  { %669 = vmatpush.msra.mxu1 %v646_v15 }
 0x604   :  { %607 = vmatmul.f32.vlgmr.msrb.gmra.mxu0 %v1922_v40  ;;  %767 = vmatmul.f32.gmra.mxu2 %v1922_v40 }
 0x605   :  { %1066 = vmatpush.msrb.mxu0 %v1811_v17  ;;  %670 = vmatpush.msra.mxu1 %v645_v16 }
 0x607   :  { %1067 = vmatpush.msrb.mxu0 %v1813_v18  ;;  %671 = vmatpush.msra.mxu1 %v644_v24 }
 0x609   :  { %1068 = vmatpush.msrb.mxu0 %v1818_v47  ;;  %672 = vmatpush.msra.mxu1 %v643_v26 }
 0x60b   :  { %1069 = vmatpush.msrb.mxu0 %v1822_v7  ;;  %673 = vmatpush.msra.mxu1 %v642_v30 }
 0x60d   :  { %1070 = vmatpush.msrb.mxu0 %v1826_v21  ;;  %934 = vmatpush.msrb.mxu1 %v1811_v17 }
 0x60f   :  { %1071 = vmatpush.msrb.mxu0 %v1830_v22  ;;  %935 = vmatpush.msrb.mxu1 %v1813_v18 }
 0x611   :  { %1072 = vmatpush.msrb.mxu0 %v1834_v23  ;;  %936 = vmatpush.msrb.mxu1 %v1818_v47 }
 0x613   :  { %1073 = vmatpush.msrb.mxu0 %v1840_v25  ;;  %937 = vmatpush.msrb.mxu1 %v1822_v7 }
 0x615   :  { %1074 = vmatpush.msrb.mxu0 %v1844_v27  ;;  %938 = vmatpush.msrb.mxu1 %v1826_v21 }
 0x617   :  { %1075 = vmatpush.msrb.mxu0 %v1848_v28  ;;  %939 = vmatpush.msrb.mxu1 %v1830_v22 }
 0x619   :  { %v844_v46 = vpop.permute.xlu0 %843  ;;  %1076 = vmatpush.msrb.mxu0 %v1850_v29  ;;  %940 = vmatpush.msrb.mxu1 %v1834_v23 }
 0x61a   :  { %v845_v50 = vmax.f32 %v844_v46, 0.0 }
 0x61b   :  { %1077 = vmatpush.msrb.mxu0 %v1854_v31  ;;  %941 = vmatpush.msrb.mxu1 %v1840_v25 }
 0x61c   :  { %v846_v52 = vmul.f32 %v845_v50, %v1767_v36 }
 0x61d   :  { %1078 = vmatpush.msrb.mxu0 %v1860_v32  ;;  %942 = vmatpush.msrb.mxu1 %v1844_v27 }
 0x61e   :  { %v847_v54 = vsub.f32 0.0, %v846_v52 }
 0x61f   :  { %1079 = vmatpush.msrb.mxu0 %v1862_v33  ;;  %943 = vmatpush.msrb.mxu1 %v1848_v28 }
 0x620   :  { %v848_v55 = vmul.f32 %v847_v54, %v841_v19 }
 0x621   :  { %1080 = vmatpush.msrb.mxu0 %v1869_v35  ;;  %944 = vmatpush.msrb.mxu1 %v1850_v29 }
 0x622   :  { %v1942_v56 = vadd.f32 %v848_v55, %v846_v52 }
 0x623   :  { %1081 = vmatpush.msrb.mxu0 %v1873_v37  ;;  %945 = vmatpush.msrb.mxu1 %v1854_v31 }
 0x624   :  { %850 = vst [vmem:[#allocation12] sm:$0xff] %v1942_v56  ;;  %884 = vmatmul.f32.vlgmr.msra.gmra.mxu0 %v1942_v56 }
 0x625   :  { %946 = vmatpush.msrb.mxu1 %v1860_v32 }
 0x627   :  { %947 = vmatpush.msrb.mxu1 %v1862_v33 }
 0x629   :  { %948 = vmatpush.msrb.mxu1 %v1869_v35 }
 0x62b   :  { %949 = vmatpush.msrb.mxu1 %v1873_v37 }
 0x681   :  { %v608_v61 = vpop.f32.mrf.mxu0 }
 0x682   :  { %v611_v62 = vadd.f32 %v608_v61, %v155_v60 }
 0x684   :  { %631 = vrot.lane.b32.xlu1 %v611_v62, %s1540_s22  ;;  %v1348_v34 = vmul.f32 -1.442695, %v611_v62 }
 0x686   :  { %1396 = vpow2.f32 %v1348_v34 }
 0x68c   :  { %v1397_v39 = vpop.eup %1396 }
 0x68d   :  { %v615_v41 = vadd.f32 1.0, %v1397_v39 }
 0x68f   :  { %v627_v54 = vand.u32 2147483648, %v615_v41  ;;  %vm621_vm15 = vweird.f32 %v615_v41  ;;  %v625_v19 = vand.u32 2147483647, %v615_v41 }
 0x691   :  { %v628_v62 = vor.u32 1.1754944e-38, %v627_v54  ;;  %vm626_vm2 = vcmp.eq.f32.partialorder %v625_v19, 8.507059e+37 }
 0x6a1   :  { %v885_v8 = vpop.f32.mrf.mxu0 }
 0x6a2   :  { %v888_v9 = vadd.f32 %v885_v8, %v757_v5 }
 0x6a4   :  { %908 = vrot.lane.b32.xlu2 %v888_v9, %s1540_s22  ;;  %v1351_v38 = vmul.f32 -1.442695, %v888_v9 }
 0x6a6   :  { %1398 = vpow2.f32 %v1351_v38 }
 0x6a7   :  { %1400 = vrcp.f32 %v615_v41 }
 0x6ac   :  { %v1399_v42 = vpop.eup %1398 }
 0x6ad   :  { %v892_v43 = vadd.f32 1.0, %v1399_v42  ;;  %v1401_v44 = vpop.eup %1400 }
 0x6ae   :  { %v617_v45 = vmul.f32 %v1401_v44, %v615_v41  ;;  %vm622_vm14 = vweird.f32 %v1401_v44 }
 0x6af   :  { %1402 = vrcp.f32 %v892_v43  ;;  %vm623_vm1 = vmor %vm621_vm15, %vm622_vm14  ;;  %v904_v4 = vand.u32 2147483648, %v892_v43  ;;  %vm898_vm4 = vweird.f32 %v892_v43  ;;  %v902_v6 = vand.u32 2147483647, %v892_v43 }
 0x6b0   :  { %v618_v46 = vsub.f32 1.0, %v617_v45 }
 0x6b1   :  { %vm903_vm6 = vcmp.eq.f32.partialorder %v902_v6, 8.507059e+37 }
 0x6b2   :  { %v619_v50 = vmul.f32 %v1401_v44, %v618_v46 }
 0x6b4   :  { %v620_v52 = vadd.f32 %v1401_v44, %v619_v50 }
 0x6b5   :  { %v1403_v48 = vpop.eup %1402 }
 0x6b6   :  { %v894_v49 = vmul.f32 %v1403_v48, %v892_v43  ;;  %v624_v57 = vsel %vm623_vm1, %v1401_v44, %v620_v52  ;;  %vm899_vm3 = vweird.f32 %v1403_v48 }
 0x6b7   :  { %v629_v0 = vsel %vm626_vm2, %v628_v62, %v624_v57  ;;  %vm900_vm5 = vmor %vm898_vm4, %vm899_vm3 }
 0x6b8   :  { %v895_v51 = vsub.f32 1.0, %v894_v49 }
 0x6ba   :  { %v896_v61 = vmul.f32 %v1403_v48, %v895_v51 }
 0x6bc   :  { %v897_v2 = vadd.f32 %v1403_v48, %v896_v61 }
 0x6be   :  { %v901_v9 = vsel %vm900_vm5, %v1403_v48, %v897_v2 }
 0x6f6   :  { %v632_v53 = vpop.permute.xlu1 %631 }
 0x6f7   :  { %v633_v55 = vmax.f32 %v632_v53, 0.0 }
 0x6f9   :  { %v634_v60 = vmul.f32 %v633_v55, %v1767_v36 }
 0x6fb   :  { %v635_v63 = vsub.f32 %v1922_v40, %v634_v60  ;;  %v905_v40 = vor.u32 1.1754944e-38, %v904_v4 }
 0x6fd   :  { %v636_v1 = vmul.f32 %v635_v63, %v629_v0  ;;  %v906_v12 = vsel %vm903_vm6, %v905_v40, %v901_v9 }
 0x6fe   :  { %v909_v3 = vpop.permute.xlu2 %908 }
 0x6ff   :  { %v1971_v5 = vadd.f32 %v636_v1, %v634_v60  ;;  %v910_v8 = vmax.f32 %v909_v3, 0.0 }
 0x701   :  { %v911_v10 = vmul.f32 %v910_v8, %v1767_v36  ;;  %674 = vmatmul.f32.vlgmr.msra.gmra.mxu1 %v1971_v5  ;;  %770 = vmatmul.f32.gmra.mxu2 %v1971_v5 }
 0x702   :  { %1132 = vmatpush.msra.mxu1 %v1811_v17 }
 0x703   :  { %v912_v11 = vsub.f32 %v1942_v56, %v911_v10 }
 0x704   :  { %1133 = vmatpush.msra.mxu1 %v1813_v18  ;;  %v759_v18 = vpop.f32.mrf.mxu2 }
 0x705   :  { %v913_v13 = vmul.f32 %v912_v11, %v906_v12 }
 0x706   :  { %1134 = vmatpush.msra.mxu1 %v1818_v47  ;;  %v760_v47 = vadd.f32 %v1911_v59, %v759_v18 }
 0x707   :  { %v914_v14 = vadd.f32 %v913_v13, %v911_v10 }
 0x708   :  { %1135 = vmatpush.msra.mxu1 %v1822_v7 }
 0x709   :  { %916 = vst [vmem:[#allocation12 + $0x8] sm:$0xff] %v914_v14  ;;  %950 = vmatmul.f32.vlgmr.msrb.gmra.mxu1 %v914_v14 }
 0x70a   :  { %1136 = vmatpush.msra.mxu1 %v1826_v21 }
 0x70c   :  { %1137 = vmatpush.msra.mxu1 %v1830_v22  ;;  %v158_v22 = vadd.f32 %v1758_v20, %v1947_v58  ;;  %v762_v0 = vpop.f32.mrf.mxu2 }
 0x70d   :  { %v763_v1 = vadd.f32 %v1911_v59, %v762_v0  ;;  %v1187_v0 = vld [vmem:[#allocation11 + $0x28] sm:$0xff] }
 0x70e   :  { %1138 = vmatpush.msra.mxu1 %v1834_v23 }
 0x710   :  { %1139 = vmatpush.msra.mxu1 %v1840_v25 }
 0x712   :  { %1140 = vmatpush.msra.mxu1 %v1844_v27 }
 0x714   :  { %1141 = vmatpush.msra.mxu1 %v1848_v28 }
 0x716   :  { %1142 = vmatpush.msra.mxu1 %v1850_v29 }
 0x718   :  { %1143 = vmatpush.msra.mxu1 %v1854_v31 }
 0x71a   :  { %1144 = vmatpush.msra.mxu1 %v1860_v32 }
 0x71c   :  { %1145 = vmatpush.msra.mxu1 %v1862_v33 }
 0x71e   :  { %1146 = vmatpush.msra.mxu1 %v1869_v35 }
 0x720   :  { %1147 = vmatpush.msra.mxu1 %v1873_v37 }
 0x77e   :  { %v675_v17 = vpop.f32.mrf.mxu1 }
 0x77f   :  { %v678_v23 = vadd.f32 %v675_v17, %v158_v22 }
 0x781   :  { %v1349_v27 = vmul.f32 -1.442695, %v678_v23 }
 0x786   :  { %v951_v7 = vpop.f32.mrf.mxu1 }
 0x787   :  { %v954_v21 = vadd.f32 %v951_v7, %v760_v47 }
 0x789   :  { %974 = vrot.lane.b32.xlu0 %v954_v21, %s1540_s22  ;;  %v1352_v25 = vmul.f32 -1.442695, %v954_v21 }
 0x78b   :  { %1404 = vpow2.f32 %v1352_v25 }
 0x78c   :  { %1406 = vpow2.f32 %v1349_v27  ;;  %v765_v27 = vpop.f32.mrf.mxu2 }
 0x791   :  { %698 = vrot.lane.b32.xlu0 %v678_v23, %s1540_s22  ;;  %v1405_v28 = vpop.eup %1404 }
 0x792   :  { %v958_v29 = vadd.f32 1.0, %v1405_v28  ;;  %v1407_v31 = vpop.eup %1406  ;;  %v766_v28 = vadd.f32 %v1911_v59, %v765_v27 }
 0x793   :  { %v682_v35 = vadd.f32 1.0, %v1407_v31 }
 0x794   :  { %1408 = vrcp.f32 %v958_v29  ;;  %v970_v34 = vand.u32 2147483648, %v958_v29  ;;  %vm964_vm8 = vweird.f32 %v958_v29  ;;  %v968_v38 = vand.u32 2147483647, %v958_v29 }
 0x795   :  { %1410 = vrcp.f32 %v682_v35  ;;  %v694_v51 = vand.u32 2147483648, %v682_v35  ;;  %vm688_vm11 = vweird.f32 %v682_v35  ;;  %v692_v54 = vand.u32 2147483647, %v682_v35 }
 0x796   :  { %v971_v44 = vor.u32 1.1754944e-38, %v970_v34  ;;  %vm969_vm0 = vcmp.eq.f32.partialorder %v968_v38, 8.507059e+37 }
 0x797   :  { %v695_v57 = vor.u32 1.1754944e-38, %v694_v51  ;;  %vm693_vm13 = vcmp.eq.f32.partialorder %v692_v54, 8.507059e+37  ;;  %v1194_v51 = vld [vmem:[#allocation11 + $0x60] sm:$0xff]  ;;  %v1192_v54 = vld [vmem:[#allocation11 + $0x50] sm:$0xff] }
 0x79a   :  { %v1409_v37 = vpop.eup %1408 }
 0x79b   :  { %v960_v56 = vmul.f32 %v1409_v37, %v958_v29  ;;  %v1411_v16 = vpop.eup %1410  ;;  %vm965_vm7 = vweird.f32 %v1409_v37 }
 0x79c   :  { %v684_v26 = vmul.f32 %v1411_v16, %v682_v35  ;;  %vm966_vm9 = vmor %vm964_vm8, %vm965_vm7  ;;  %vm689_vm10 = vweird.f32 %v1411_v16 }
 0x79d   :  { %v961_v15 = vsub.f32 1.0, %v960_v56  ;;  %vm690_vm12 = vmor %vm688_vm11, %vm689_vm10 }
 0x79e   :  { %v685_v58 = vsub.f32 1.0, %v684_v26 }
 0x79f   :  { %v962_v24 = vmul.f32 %v1409_v37, %v961_v15 }
 0x7a0   :  { %v686_v43 = vmul.f32 %v1411_v16, %v685_v58 }
 0x7a1   :  { %v963_v20 = vadd.f32 %v1409_v37, %v962_v24 }
 0x7a2   :  { %v687_v49 = vadd.f32 %v1411_v16, %v686_v43 }
 0x7a3   :  { %v967_v41 = vsel %vm966_vm9, %v1409_v37, %v963_v20 }
 0x7a4   :  { %v972_v46 = vsel %vm969_vm0, %v971_v44, %v967_v41  ;;  %v691_v55 = vsel %vm690_vm12, %v1411_v16, %v687_v49  ;;  %v1196_v49 = vld [vmem:[#allocation11 + $0x70] sm:$0xff] }
 0x7a5   :  { %v696_v61 = vsel %vm693_vm13, %v695_v57, %v691_v55  ;;  %v1191_v55 = vld [vmem:[#allocation11 + $0x48] sm:$0xff] }
 0x7fb   :  { %v975_v30 = vpop.permute.xlu0 %974 }
 0x7fc   :  { %v976_v39 = vmax.f32 %v975_v30, 0.0 }
 0x7fe   :  { %v977_v42 = vmul.f32 %v976_v39, %v1767_v36 }
 0x800   :  { %v978_v45 = vsub.f32 %v914_v14, %v977_v42 }
 0x802   :  { %v979_v48 = vmul.f32 %v978_v45, %v972_v46 }
 0x803   :  { %v699_v50 = vpop.permute.xlu0 %698 }
 0x804   :  { %v980_v52 = vadd.f32 %v979_v48, %v977_v42  ;;  %v700_v53 = vmax.f32 %v699_v50, 0.0  ;;  %v1197_v48 = vld [vmem:[#allocation11 + $0x78] sm:$0xff]  ;;  %v1195_v50 = vld [vmem:[#allocation11 + $0x68] sm:$0xff] }
 0x805   :  { %1198 = vmatpush.msrb.mxu2 %v1197_v48  ;;  %1264 = vmatpush.msra.mxu3 %v1197_v48 }
 0x806   :  { %982 = vst [vmem:[#allocation12 + $0x10] sm:$0xff] %v980_v52  ;;  %v701_v19 = vmul.f32 %v700_v53, %v1767_v36  ;;  %1016 = vmatmul.f32.vlgmr.msrb.gmra.mxu3 %v980_v52  ;;  %v768_v53 = vpop.f32.mrf.mxu2 }
 0x807   :  { %1199 = vmatpush.msrb.mxu2 %v1196_v49  ;;  %1265 = vmatpush.msra.mxu3 %v1196_v49 }
 0x808   :  { %v702_v60 = vsub.f32 %v1971_v5, %v701_v19 }
 0x809   :  { %1200 = vmatpush.msrb.mxu2 %v1195_v50  ;;  %1266 = vmatpush.msra.mxu3 %v1195_v50 }
 0x80a   :  { %v703_v62 = vmul.f32 %v702_v60, %v696_v61  ;;  %v1190_v61 = vld [vmem:[#allocation11 + $0x40] sm:$0xff] }
 0x80b   :  { %1201 = vmatpush.msrb.mxu2 %v1194_v51  ;;  %1267 = vmatpush.msra.mxu3 %v1194_v51 }
 0x80c   :  { %v704_v63 = vadd.f32 %v703_v62, %v701_v19  ;;  %v769_v19 = vadd.f32 %v1911_v59, %v768_v53  ;;  %v1189_v62 = vld [vmem:[#allocation11 + $0x38] sm:$0xff] }
 0x80e   :  { %773 = vmatmul.f32.gmra.mxu2 %v704_v63  ;;  %v1188_v63 = vld [vmem:[#allocation11 + $0x30] sm:$0xff] }
 0x889   :  { %v1017_v2 = vpop.f32.mrf.mxu3 }
 0x88a   :  { %v1020_v3 = vadd.f32 %v1017_v2, %v763_v1  ;;  %v1186_v1 = vld [vmem:[#allocation11 + $0x20] sm:$0xff] }
 0x88c   :  { %1040 = vrot.lane.b32.xlu1 %v1020_v3, %s1540_s22  ;;  %v1353_v4 = vmul.f32 -1.442695, %v1020_v3 }
 0x88e   :  { %1412 = vpow2.f32 %v1353_v4 }
 0x894   :  { %v1413_v6 = vpop.eup %1412 }
 0x895   :  { %v1024_v8 = vadd.f32 1.0, %v1413_v6  ;;  %v1183_v6 = vld [vmem:[#allocation11 + $0x8] sm:$0xff] }
 0x897   :  { %1414 = vrcp.f32 %v1024_v8  ;;  %v1036_v13 = vand.u32 2147483648, %v1024_v8  ;;  %vm1030_vm15 = vweird.f32 %v1024_v8  ;;  %v1034_v14 = vand.u32 2147483647, %v1024_v8 }
 0x899   :  { %v1037_v7 = vor.u32 1.1754944e-38, %v1036_v13  ;;  %vm1035_vm2 = vcmp.eq.f32.partialorder %v1034_v14, 8.507059e+37 }
 0x89d   :  { %v1415_v9 = vpop.eup %1414 }
 0x89e   :  { %v1026_v10 = vmul.f32 %v1415_v9, %v1024_v8  ;;  %vm1031_vm14 = vweird.f32 %v1415_v9  ;;  %v1182_v8 = vld [vmem:[#allocation11] sm:$0xff] }
 0x89f   :  { %vm1032_vm1 = vmor %vm1030_vm15, %vm1031_vm14 }
 0x8a0   :  { %v1027_v5 = vsub.f32 1.0, %v1026_v10 }
 0x8a2   :  { %v1028_v40 = vmul.f32 %v1415_v9, %v1027_v5 }
 0x8a4   :  { %v1029_v11 = vadd.f32 %v1415_v9, %v1028_v40 }
 0x8a6   :  { %v1033_v18 = vsel %vm1032_vm1, %v1415_v9, %v1029_v11 }
 0x8a7   :  { %v1038_v22 = vsel %vm1035_vm2, %v1037_v7, %v1033_v18 }
 0x8fe   :  { %v1041_v12 = vpop.permute.xlu1 %1040 }
 0x8ff   :  { %v1042_v17 = vmax.f32 %v1041_v12, 0.0 }
 0x901   :  { %v1043_v47 = vmul.f32 %v1042_v17, %v1767_v36 }
 0x903   :  { %v1044_v21 = vsub.f32 %v980_v52, %v1043_v47  ;;  %v1193_v52 = vld [vmem:[#allocation11 + $0x58] sm:$0xff] }
 0x904   :  { %1202 = vmatpush.msrb.mxu2 %v1193_v52  ;;  %1268 = vmatpush.msra.mxu3 %v1193_v52 }
 0x905   :  { %v1045_v23 = vmul.f32 %v1044_v21, %v1038_v22 }
 0x906   :  { %1203 = vmatpush.msrb.mxu2 %v1192_v54  ;;  %1269 = vmatpush.msra.mxu3 %v1192_v54 }
 0x907   :  { %v1046_v25 = vadd.f32 %v1045_v23, %v1043_v47  ;;  %v771_v23 = vpop.f32.mrf.mxu2 }
 0x908   :  { %1204 = vmatpush.msrb.mxu2 %v1191_v55  ;;  %1270 = vmatpush.msra.mxu3 %v1191_v55  ;;  %v772_v27 = vadd.f32 %v1911_v59, %v771_v23 }
 0x909   :  { %1048 = vst [vmem:[#allocation12 + $0x18] sm:$0xff] %v1046_v25  ;;  %1082 = vmatmul.f32.vlgmr.msrb.gmra.mxu0 %v1046_v25 }
 0x90a   :  { %1205 = vmatpush.msrb.mxu2 %v1190_v61  ;;  %1271 = vmatpush.msra.mxu3 %v1190_v61 }
 0x90c   :  { %1206 = vmatpush.msrb.mxu2 %v1189_v62  ;;  %1272 = vmatpush.msra.mxu3 %v1189_v62 }
 0x90e   :  { %1207 = vmatpush.msrb.mxu2 %v1188_v63  ;;  %1273 = vmatpush.msra.mxu3 %v1188_v63 }
 0x910   :  { %1208 = vmatpush.msrb.mxu2 %v1187_v0  ;;  %1274 = vmatpush.msra.mxu3 %v1187_v0 }
 0x912   :  { %1209 = vmatpush.msrb.mxu2 %v1186_v1  ;;  %1275 = vmatpush.msra.mxu3 %v1186_v1 }
 0x914   :  { %1210 = vmatpush.msrb.mxu2 %v1860_v32 }
 0x916   :  { %1211 = vmatpush.msrb.mxu2 %v1862_v33 }
 0x918   :  { %1212 = vmatpush.msrb.mxu2 %v1183_v6 }
 0x91a   :  { %1213 = vmatpush.msrb.mxu2 %v1182_v8 }
 0x986   :  { %v1083_v29 = vpop.f32.mrf.mxu0 }
 0x987   :  { %v1086_v31 = vadd.f32 %v1083_v29, %v766_v28 }
 0x989   :  { %1106 = vrot.lane.b32.xlu2 %v1086_v31, %s1540_s22  ;;  %v1354_v35 = vmul.f32 -1.442695, %v1086_v31 }
 0x98b   :  { %1416 = vpow2.f32 %v1354_v35 }
 0x991   :  { %v1417_v37 = vpop.eup %1416 }
 0x992   :  { %v1090_v56 = vadd.f32 1.0, %v1417_v37  ;;  %v1251_v37 = vld [vmem:[#allocation11 + $0x18] sm:$0xff] }
 0x993   :  { %1276 = vmatpush.msra.mxu3 %v1251_v37 }
 0x994   :  { %1418 = vrcp.f32 %v1090_v56  ;;  %v1102_v30 = vand.u32 2147483648, %v1090_v56  ;;  %vm1096_vm4 = vweird.f32 %v1090_v56  ;;  %v1100_v34 = vand.u32 2147483647, %v1090_v56 }
 0x996   :  { %v1103_v42 = vor.u32 1.1754944e-38, %v1102_v30  ;;  %vm1101_vm6 = vcmp.eq.f32.partialorder %v1100_v34, 8.507059e+37 }
 0x99a   :  { %v1419_v15 = vpop.eup %1418 }
 0x99b   :  { %v1092_v16 = vmul.f32 %v1419_v15, %v1090_v56  ;;  %vm1097_vm3 = vweird.f32 %v1419_v15  ;;  %v1250_v56 = vld [vmem:[#allocation11 + $0x10] sm:$0xff] }
 0x99c   :  { %vm1098_vm5 = vmor %vm1096_vm4, %vm1097_vm3  ;;  %1277 = vmatpush.msra.mxu3 %v1250_v56 }
 0x99d   :  { %v1093_v24 = vsub.f32 1.0, %v1092_v16 }
 0x99e   :  { %1278 = vmatpush.msra.mxu3 %v1183_v6 }
 0x99f   :  { %v1094_v26 = vmul.f32 %v1419_v15, %v1093_v24 }
 0x9a0   :  { %1279 = vmatpush.msra.mxu3 %v1182_v8 }
 0x9a1   :  { %v1095_v20 = vadd.f32 %v1419_v15, %v1094_v26 }
 0x9a3   :  { %v1099_v39 = vsel %vm1098_vm5, %v1419_v15, %v1095_v20 }
 0x9a4   :  { %v1104_v44 = vsel %vm1101_vm6, %v1103_v42, %v1099_v39 }
 0x9e3   :  { %v1107_v58 = vpop.permute.xlu2 %1106 }
 0x9e4   :  { %v1108_v38 = vmax.f32 %v1107_v58, 0.0 }
 0x9e6   :  { %v1109_v41 = vmul.f32 %v1108_v38, %v1767_v36 }
 0x9e8   :  { %v1110_v43 = vsub.f32 %v1046_v25, %v1109_v41  ;;  %v774_v25 = vpop.f32.mrf.mxu2 }
 0x9e9   :  { %v775_v49 = vadd.f32 %v1911_v59, %v774_v25 }
 0x9ea   :  { %v1111_v45 = vmul.f32 %v1110_v43, %v1104_v44 }
 0x9ec   :  { %v2007_v46 = vadd.f32 %v1111_v45, %v1109_v41 }
 0x9ee   :  { %1114 = vst [vmem:[#allocation12 + $0x20] sm:$0xff] %v2007_v46  ;;  %1148 = vmatmul.f32.vlgmr.msra.gmra.mxu1 %v2007_v46 }
 0xa6b   :  { %v1149_v57 = vpop.f32.mrf.mxu1 }
 0xa6c   :  { %v1152_v60 = vadd.f32 %v1149_v57, %v769_v19 }
 0xa6e   :  { %1172 = vrot.lane.b32.xlu1 %v1152_v60, %s1540_s22  ;;  %v1355_v2 = vmul.f32 -1.442695, %v1152_v60 }
 0xa70   :  { %1420 = vpow2.f32 %v1355_v2 }
 0xa76   :  { %v1421_v3 = vpop.eup %1420 }
 0xa77   :  { %v1156_v4 = vadd.f32 1.0, %v1421_v3 }
 0xa79   :  { %1422 = vrcp.f32 %v1156_v4  ;;  %v1168_v13 = vand.u32 2147483648, %v1156_v4  ;;  %vm1162_vm8 = vweird.f32 %v1156_v4  ;;  %v1166_v32 = vand.u32 2147483647, %v1156_v4 }
 0xa7b   :  { %v1169_v18 = vor.u32 1.1754944e-38, %v1168_v13  ;;  %vm1167_vm0 = vcmp.eq.f32.partialorder %v1166_v32, 8.507059e+37 }
 0xa7f   :  { %v1423_v9 = vpop.eup %1422 }
 0xa80   :  { %v1158_v10 = vmul.f32 %v1423_v9, %v1156_v4  ;;  %vm1163_vm7 = vweird.f32 %v1423_v9 }
 0xa81   :  { %vm1164_vm9 = vmor %vm1162_vm8, %vm1163_vm7 }
 0xa82   :  { %v1159_v5 = vsub.f32 1.0, %v1158_v10 }
 0xa84   :  { %v1160_v40 = vmul.f32 %v1423_v9, %v1159_v5 }
 0xa86   :  { %v1161_v11 = vadd.f32 %v1423_v9, %v1160_v40 }
 0xa88   :  { %v1165_v14 = vsel %vm1164_vm9, %v1423_v9, %v1161_v11 }
 0xa89   :  { %v1170_v7 = vsel %vm1167_vm0, %v1169_v18, %v1165_v14 }
 0xae0   :  { %v1173_v12 = vpop.permute.xlu1 %1172 }
 0xae1   :  { %v1174_v33 = vmax.f32 %v1173_v12, 0.0 }
 0xae3   :  { %v1175_v17 = vmul.f32 %v1174_v33, %v1767_v36 }
 0xae5   :  { %v1176_v47 = vsub.f32 %v2007_v46, %v1175_v17 }
 0xae7   :  { %v1177_v21 = vmul.f32 %v1176_v47, %v1170_v7 }
 0xae9   :  { %v1178_v22 = vadd.f32 %v1177_v21, %v1175_v17 }
 0xaeb   :  { %1180 = vst [vmem:[#allocation12 + $0x28] sm:$0xff] %v1178_v22  ;;  %1214 = vmatmul.f32.vlgmr.msrb.gmra.mxu2 %v1178_v22 }
 0xb6e   :  { %v1215_v28 = vpop.f32.mrf.mxu2 }
 0xb6f   :  { %v1218_v29 = vadd.f32 %v1215_v28, %v772_v27 }
 0xb71   :  { %1238 = vrot.lane.b32.xlu2 %v1218_v29, %s1540_s22  ;;  %v1356_v31 = vmul.f32 -1.442695, %v1218_v29 }
 0xb73   :  { %1424 = vpow2.f32 %v1356_v31 }
 0xb79   :  { %v1425_v35 = vpop.eup %1424 }
 0xb7a   :  { %v1222_v15 = vadd.f32 1.0, %v1425_v35 }
 0xb7c   :  { %1426 = vrcp.f32 %v1222_v15  ;;  %v1234_v34 = vand.u32 2147483648, %v1222_v15  ;;  %vm1228_vm11 = vweird.f32 %v1222_v15  ;;  %v1232_v38 = vand.u32 2147483647, %v1222_v15 }
 0xb7e   :  { %v1235_v43 = vor.u32 1.1754944e-38, %v1234_v34  ;;  %vm1233_vm13 = vcmp.eq.f32.partialorder %v1232_v38, 8.507059e+37 }
 0xb82   :  { %v1427_v16 = vpop.eup %1426 }
 0xb83   :  { %v1224_v24 = vmul.f32 %v1427_v16, %v1222_v15  ;;  %vm1229_vm10 = vweird.f32 %v1427_v16 }
 0xb84   :  { %vm1230_vm12 = vmor %vm1228_vm11, %vm1229_vm10 }
 0xb85   :  { %v1225_v26 = vsub.f32 1.0, %v1224_v24 }
 0xb87   :  { %v1226_v20 = vmul.f32 %v1427_v16, %v1225_v26 }
 0xb89   :  { %v1227_v58 = vadd.f32 %v1427_v16, %v1226_v20 }
 0xb8b   :  { %v1231_v41 = vsel %vm1230_vm12, %v1427_v16, %v1227_v58 }
 0xb8c   :  { %v1236_v45 = vsel %vm1233_vm13, %v1235_v43, %v1231_v41 }
 0xbcb   :  { %v1239_v30 = vpop.permute.xlu2 %1238 }
 0xbcc   :  { %v1240_v39 = vmax.f32 %v1239_v30, 0.0 }
 0xbce   :  { %v1241_v42 = vmul.f32 %v1240_v39, %v1767_v36 }
 0xbd0   :  { %v1242_v44 = vsub.f32 %v1178_v22, %v1241_v42 }
 0xbd2   :  { %v1243_v46 = vmul.f32 %v1242_v44, %v1236_v45 }
 0xbd4   :  { %v1244_v48 = vadd.f32 %v1243_v46, %v1241_v42 }
 0xbd6   :  { %1246 = vst [vmem:[#allocation12 + $0x30] sm:$0xff] %v1244_v48  ;;  %1280 = vmatmul.f32.vlgmr.msra.gmra.mxu3 %v1244_v48 }
 0xc59   :  { %v1281_v50 = vpop.f32.mrf.mxu3 }
 0xc5a   :  { %v1284_v51 = vadd.f32 %v1281_v50, %v775_v49 }
 0xc5c   :  { %1304 = vrot.lane.b32.xlu0 %v1284_v51, %s1540_s22  ;;  %v1357_v52 = vmul.f32 -1.442695, %v1284_v51 }
 0xc5e   :  { %1428 = vpow2.f32 %v1357_v52 }
 0xc64   :  { %v1429_v53 = vpop.eup %1428 }
 0xc65   :  { %v1288_v54 = vadd.f32 1.0, %v1429_v53 }
 0xc67   :  { %1430 = vrcp.f32 %v1288_v54  ;;  %v1300_v63 = vand.u32 2147483648, %v1288_v54  ;;  %vm1294_vm15 = vweird.f32 %v1288_v54  ;;  %v1298_v0 = vand.u32 2147483647, %v1288_v54 }
 0xc69   :  { %v1301_v3 = vor.u32 1.1754944e-38, %v1300_v63  ;;  %vm1299_vm2 = vcmp.eq.f32.partialorder %v1298_v0, 8.507059e+37 }
 0xc6d   :  { %v1431_v19 = vpop.eup %1430 }
 0xc6e   :  { %v1290_v55 = vmul.f32 %v1431_v19, %v1288_v54  ;;  %vm1295_vm14 = vweird.f32 %v1431_v19 }
 0xc6f   :  { %vm1296_vm1 = vmor %vm1294_vm15, %vm1295_vm14 }
 0xc70   :  { %v1291_v57 = vsub.f32 1.0, %v1290_v55 }
 0xc72   :  { %v1292_v60 = vmul.f32 %v1431_v19, %v1291_v57 }
 0xc74   :  { %v1293_v61 = vadd.f32 %v1431_v19, %v1292_v60 }
 0xc76   :  { %v1297_v1 = vsel %vm1296_vm1, %v1431_v19, %v1293_v61 }
 0xc77   :  { %v1302_v6 = vsel %vm1299_vm2, %v1301_v3, %v1297_v1 }
 0xcce   :  { %v1305_v62 = vpop.permute.xlu0 %1304 }
 0xccf   :  { %v1306_v59 = vmax.f32 %v1305_v62, 0.0 }
 0xcd1   :  { %v1307_v2 = vmul.f32 %v1306_v59, %v1767_v36 }
 0xcd3   :  { %v1308_v4 = vsub.f32 %v1244_v48, %v1307_v2 }
 0xcd5   :  { %v1309_v8 = vmul.f32 %v1308_v4, %v1302_v6 }
 0xcd7   :  { %v1310_v9 = vadd.f32 %v1309_v8, %v1307_v2 }
 0xcd9   :  { %1312 = vst [vmem:[#allocation12 + $0x38] sm:$0xff] %v1310_v9 }
 0xcda   :  { %1326 = dma.vmem_to_hbm [thread:$0]  %s1319_s5, 1024, %s1321_s16, [#allocation8], %s1535_s9, %s1535_s9, %s1536_s10  }
 0xcdb   :  { %1532 = dma.done.wait [#allocation8], 1024  }
 0xcdc   :  { %1533 = vsyncadd [#allocation8], 4294966272 }
 0xcdd   :  { %1331 = vsyncpa [#allocation7], 1 }
 0xcde   :  { %1332 = vsyncpa [#allocation10], 1 }
 0xcdf   :  { %1333 = vsyncpa [#allocation8], 1 }

</bundles_post_ra>
